<compile_context>
chip_gen: v7x
topology: tpu7x:2x2x1
jax: 0.10.0
libtpu: 0.0.40
codegen_flags: <defaults>
</compile_context>

<pallas_src>
import functools

import jax
import jax.numpy as jnp
from jax import lax
from jax.experimental import pallas as pl
from jax.experimental.pallas import tpu as pltpu


def _critic_kernel(s_ref, w1_ref, b1_ref,
                   wih_r_ref, wih_z_ref, wih_n_ref,
                   whh_r_ref, whh_z_ref, whh_n_ref,
                   b_r_ref, b_z_ref, b_ni_ref, b_nh_ref,
                   wv_ref, bv_ref,
                   out_ref,
                   gi_r_ref, gi_z_ref, gi_n_ref, h_all_ref,
                   *, bs_p, max_t):
    """Whole JointRNNCritic forward in one invocation.

    s_ref      : (T*bs_p, D)   time-major, batch-padded state rows
    w1_ref     : (D, H)        fc1 weight (pre-transposed)
    b1_ref     : (1, H)
    wih_*_ref  : (H, H)        GRUCell W_ih split per gate (pre-transposed)
    whh_*_ref  : (H, H)        GRUCell W_hh split per gate (pre-transposed)
    b_r/b_z    : (1, H)        b_ih_r+b_hh_r / b_ih_z+b_hh_z (folded)
    b_ni/b_nh  : (1, H)        b_ih_n / b_hh_n
    wv_ref     : (H, 1)        v_out weight (pre-transposed), bv_ref: (1, 1)
    out_ref    : (T*bs_p, 1)   value per (t, b) row
    gi_*_ref   : (T*bs_p, H)   VMEM scratch: hoisted per-gate input projections
    h_all_ref  : (T*bs_p, H)   VMEM scratch: hidden state of every time step
    """
    hidden = wih_r_ref.shape[1]
    f32 = jnp.float32

    # ---- Hoisted, batched over all T*bs_p rows (MXU-friendly M dimension) ----
    x_all = jnp.dot(s_ref[...], w1_ref[...], preferred_element_type=f32) + b1_ref[...]
    x_all = jnp.maximum(x_all, 0.0)                       # relu(fc1(inputs))
    gi_r_ref[...] = jnp.dot(x_all, wih_r_ref[...], preferred_element_type=f32) + b_r_ref[...]
    gi_z_ref[...] = jnp.dot(x_all, wih_z_ref[...], preferred_element_type=f32) + b_z_ref[...]
    gi_n_ref[...] = jnp.dot(x_all, wih_n_ref[...], preferred_element_type=f32) + b_ni_ref[...]

    # Loop-invariant loads hoisted out of the recurrence.
    whh_r = whh_r_ref[...]
    whh_z = whh_z_ref[...]
    whh_n = whh_n_ref[...]
    b_nh = b_nh_ref[...]

    def step(t, h):
        row = pl.multiple_of(t * bs_p, bs_p)              # tile-aligned (bs_p % 8 == 0)
        g_r = gi_r_ref[pl.ds(row, bs_p), :]
        g_z = gi_z_ref[pl.ds(row, bs_p), :]
        g_n = gi_n_ref[pl.ds(row, bs_p), :]
        # PyTorch GRUCell gate order (r, z, n):
        r = jax.nn.sigmoid(g_r + jnp.dot(h, whh_r, preferred_element_type=f32))
        z = jax.nn.sigmoid(g_z + jnp.dot(h, whh_z, preferred_element_type=f32))
        n = jnp.tanh(g_n + r * (jnp.dot(h, whh_n, preferred_element_type=f32) + b_nh))
        h_new = (1.0 - z) * n + z * h
        h_all_ref[pl.ds(row, bs_p), :] = h_new
        return h_new

    # h_in = zeros, matching `fc1.weight.new(bs, H).zero_()`.
    h0 = jnp.zeros((bs_p, hidden), f32)
    lax.fori_loop(0, max_t, step, h0, unroll=True)

    # ---- Value head over all time steps at once (single store) ----
    out_ref[...] = (jnp.dot(h_all_ref[...], wv_ref[...], preferred_element_type=f32)
                    + bv_ref[...])


def joint_rnn_critic_forward(state, params):
    """state: (bs, max_t, state_dim) float32 -> (bs, max_t, 1) float32."""
    bs, max_t, state_dim = state.shape
    hidden = params["w1"].shape[0]
    H = hidden
    bs_p = ((bs + 7) // 8) * 8          # pad batch to a sublane multiple of 8

    # Time-major, batch-padded, flattened to (T*bs_p, D). Padded rows compute
    # harmless garbage and are sliced away after the call.
    s_tbd = jnp.transpose(state.astype(jnp.float32), (1, 0, 2))          # (T, bs, D)
    s_pad = jnp.zeros((max_t, bs_p, state_dim), jnp.float32).at[:, :bs].set(s_tbd)
    s_flat = s_pad.reshape(max_t * bs_p, state_dim)

    # Glue: transpose / split weights once so the kernel never slices 3H columns.
    w1_t = params["w1"].T.astype(jnp.float32)                            # (D, H)
    b1 = params["b1"].reshape(1, H).astype(jnp.float32)

    w_ih = params["w_ih"].astype(jnp.float32)                            # (3H, H) [r|z|n]
    w_hh = params["w_hh"].astype(jnp.float32)
    b_ih = params["b_ih"].astype(jnp.float32)
    b_hh = params["b_hh"].astype(jnp.float32)
    wih_r, wih_z, wih_n = w_ih[0:H].T, w_ih[H:2 * H].T, w_ih[2 * H:].T   # (H, H) each
    whh_r, whh_z, whh_n = w_hh[0:H].T, w_hh[H:2 * H].T, w_hh[2 * H:].T
    b_r = (b_ih[0:H] + b_hh[0:H]).reshape(1, H)
    b_z = (b_ih[H:2 * H] + b_hh[H:2 * H]).reshape(1, H)
    b_ni = b_ih[2 * H:].reshape(1, H)
    b_nh = b_hh[2 * H:].reshape(1, H)

    wv_t = params["w_v"].T.astype(jnp.float32)                           # (H, 1)
    bv = params["b_v"].reshape(1, 1).astype(jnp.float32)

    vmem = pl.BlockSpec(memory_space=pltpu.MemorySpace.VMEM)
    kernel = functools.partial(_critic_kernel, bs_p=bs_p, max_t=max_t)

    q_flat = pl.pallas_call(
        kernel,
        out_shape=jax.ShapeDtypeStruct((max_t * bs_p, 1), jnp.float32),
        in_specs=[vmem] * 15,
        out_specs=vmem,
        scratch_shapes=[
            pltpu.VMEM((max_t * bs_p, hidden), jnp.float32),  # gi_r
            pltpu.VMEM((max_t * bs_p, hidden), jnp.float32),  # gi_z
            pltpu.VMEM((max_t * bs_p, hidden), jnp.float32),  # gi_n
            pltpu.VMEM((max_t * bs_p, hidden), jnp.float32),  # h_all
        ],
        # Safe on all generations (v5e default scoped VMEM is only 16 MiB);
        # working set here is tens of KiB so this only matters when H scales.
        compiler_params=pltpu.CompilerParams(vmem_limit_bytes=32 * 1024 * 1024),
    )(s_flat, w1_t, b1, wih_r, wih_z, wih_n, whh_r, whh_z, whh_n,
      b_r, b_z, b_ni, b_nh, wv_t, bv)

    q = q_flat.reshape(max_t, bs_p, 1)[:, :bs]     # drop padded batch rows
    return jnp.transpose(q, (1, 0, 2))             # (bs, max_t, 1)


def _reference_forward(state, params):
    """Plain-JAX reference mirroring the PyTorch forward exactly."""
    bs, max_t, _ = state.shape
    H = params["w1"].shape[0]
    h = jnp.zeros((bs, H), jnp.float32)
    outs = []
    for t in range(max_t):
        x = jax.nn.relu(state[:, t] @ params["w1"].T + params["b1"])
        gi = x @ params["w_ih"].T + params["b_ih"]
        gh = h @ params["w_hh"].T + params["b_hh"]
        r = jax.nn.sigmoid(gi[:, :H] + gh[:, :H])
        z = jax.nn.sigmoid(gi[:, H:2 * H] + gh[:, H:2 * H])
        n = jnp.tanh(gi[:, 2 * H:] + r * gh[:, 2 * H:])
        h = (1.0 - z) * n + z * h
        outs.append(h @ params["w_v"].T + params["b_v"])
    return jnp.stack(outs, axis=1)   # (bs, max_t, 1)


def _init_params(key, state_dim, hidden):
    """Deterministic synthetic weights (PyTorch-convention shapes)."""
    ks = jax.random.split(key, 9)
    u = lambda k, shape, scale: jax.random.uniform(
        k, shape, jnp.float32, minval=-scale, maxval=scale)
    s1 = 1.0 / jnp.sqrt(state_dim)
    sh = 1.0 / jnp.sqrt(hidden)
    return {
        "w1":   u(ks[0], (hidden, state_dim), s1),       # fc1.weight
        "b1":   u(ks[1], (hidden,), s1),                 # fc1.bias
        "w_ih": u(ks[2], (3 * hidden, hidden), sh),      # rnn.weight_ih
        "w_hh": u(ks[3], (3 * hidden, hidden), sh),      # rnn.weight_hh
        "b_ih": u(ks[4], (3 * hidden,), sh),             # rnn.bias_ih
        "b_hh": u(ks[5], (3 * hidden,), sh),             # rnn.bias_hh
        "w_v":  u(ks[6], (1, hidden), sh),               # v_out.weight
        "b_v":  u(ks[7], (1,), sh),                      # v_out.bias
    }


if __name__ == "__main__":
    # Small shapes consistent with the module: scheme['state']['vshape']=16,
    # rnn_hidden_dim=32, batch_size=2, max_seq_length=8.
    bs, max_t, state_dim, hidden = 2, 8, 16, 32
    key = jax.random.PRNGKey(0)
    k_state, k_params = jax.random.split(key)

    state = jax.random.normal(k_state, (bs, max_t, state_dim), jnp.float32)
    params = _init_params(k_params, state_dim, hidden)

    out = joint_rnn_critic_forward(state, params)
    out = jax.block_until_ready(out)

    ref = _reference_forward(state, params)
    assert out.shape == (bs, max_t, 1)
    assert jnp.allclose(out, ref, rtol=1e-4, atol=1e-4), (
        f"max err {jnp.max(jnp.abs(out - ref))}")
    print("KERNEL_OK")
</pallas_src>

<mosaic_0001>
module attributes {stable_mosaic.version = 11 : i64} {
  func.func @_critic_kernel(%arg0: memref<64x16xf32, #tpu.memory_space<vmem>>, %arg1: memref<16x32xf32, #tpu.memory_space<vmem>>, %arg2: memref<1x32xf32, #tpu.memory_space<vmem>>, %arg3: memref<32x32xf32, #tpu.memory_space<vmem>>, %arg4: memref<32x32xf32, #tpu.memory_space<vmem>>, %arg5: memref<32x32xf32, #tpu.memory_space<vmem>>, %arg6: memref<32x32xf32, #tpu.memory_space<vmem>>, %arg7: memref<32x32xf32, #tpu.memory_space<vmem>>, %arg8: memref<32x32xf32, #tpu.memory_space<vmem>>, %arg9: memref<1x32xf32, #tpu.memory_space<vmem>>, %arg10: memref<1x32xf32, #tpu.memory_space<vmem>>, %arg11: memref<1x32xf32, #tpu.memory_space<vmem>>, %arg12: memref<1x32xf32, #tpu.memory_space<vmem>>, %arg13: memref<32x1xf32, #tpu.memory_space<vmem>>, %arg14: memref<1x1xf32, #tpu.memory_space<vmem>>, %arg15: memref<64x1xf32, #tpu.memory_space<vmem>>, %arg16: memref<64x32xf32, #tpu.memory_space<vmem>>, %arg17: memref<64x32xf32, #tpu.memory_space<vmem>>, %arg18: memref<64x32xf32, #tpu.memory_space<vmem>>, %arg19: memref<64x32xf32, #tpu.memory_space<vmem>>) attributes {dimension_semantics = [], scalar_prefetch = 0 : i64, scratch_operands = 4 : i64, tpu.core_type = #tpu.core_type<tc>} {
    %c0 = arith.constant 0 : index
    %c0_0 = arith.constant 0 : index
    %0 = vector.load %arg0[%c0, %c0_0] : memref<64x16xf32, #tpu.memory_space<vmem>>, vector<64x16xf32>
    %c0_1 = arith.constant 0 : index
    %c0_2 = arith.constant 0 : index
    %1 = vector.load %arg1[%c0_1, %c0_2] : memref<16x32xf32, #tpu.memory_space<vmem>>, vector<16x32xf32>
    %cst = arith.constant dense<0.000000e+00> : vector<64x32xf32>
    %2 = tpu.matmul %0, %1, %cst {dimension_numbers = #tpu.dot_dimension_numbers<[1], [0], [0], [1], [0, 0, 1, 1], [], []>} : vector<64x16xf32>, vector<16x32xf32>, vector<64x32xf32> -> vector<64x32xf32>
    %c0_3 = arith.constant 0 : index
    %c0_4 = arith.constant 0 : index
    %3 = vector.load %arg2[%c0_3, %c0_4] : memref<1x32xf32, #tpu.memory_space<vmem>>, vector<1x32xf32>
    %4 = vector.broadcast %3 : vector<1x32xf32> to vector<64x32xf32>
    %5 = arith.addf %2, %4 : vector<64x32xf32>
    %cst_5 = arith.constant 0.000000e+00 : f32
    %6 = vector.broadcast %cst_5 : f32 to vector<64x32xf32>
    %7 = arith.maximumf %5, %6 : vector<64x32xf32>
    %c0_6 = arith.constant 0 : index
    %c0_7 = arith.constant 0 : index
    %8 = vector.load %arg3[%c0_6, %c0_7] : memref<32x32xf32, #tpu.memory_space<vmem>>, vector<32x32xf32>
    %cst_8 = arith.constant dense<0.000000e+00> : vector<64x32xf32>
    %9 = tpu.matmul %7, %8, %cst_8 {dimension_numbers = #tpu.dot_dimension_numbers<[1], [0], [0], [1], [0, 0, 1, 1], [], []>} : vector<64x32xf32>, vector<32x32xf32>, vector<64x32xf32> -> vector<64x32xf32>
    %c0_9 = arith.constant 0 : index
    %c0_10 = arith.constant 0 : index
    %10 = vector.load %arg9[%c0_9, %c0_10] : memref<1x32xf32, #tpu.memory_space<vmem>>, vector<1x32xf32>
    %11 = vector.broadcast %10 : vector<1x32xf32> to vector<64x32xf32>
    %12 = arith.addf %9, %11 : vector<64x32xf32>
    %c0_11 = arith.constant 0 : index
    %c0_12 = arith.constant 0 : index
    %13 = vector.load %arg16[%c0_11, %c0_12] : memref<64x32xf32, #tpu.memory_space<vmem>>, vector<64x32xf32>
    tpu.vector_store %arg16[%c0_11, %c0_12], %12 {strides = array<i32>} : memref<64x32xf32, #tpu.memory_space<vmem>>, vector<64x32xf32>,
    %c0_13 = arith.constant 0 : index
    %c0_14 = arith.constant 0 : index
    %14 = vector.load %arg4[%c0_13, %c0_14] : memref<32x32xf32, #tpu.memory_space<vmem>>, vector<32x32xf32>
    %cst_15 = arith.constant dense<0.000000e+00> : vector<64x32xf32>
    %15 = tpu.matmul %7, %14, %cst_15 {dimension_numbers = #tpu.dot_dimension_numbers<[1], [0], [0], [1], [0, 0, 1, 1], [], []>} : vector<64x32xf32>, vector<32x32xf32>, vector<64x32xf32> -> vector<64x32xf32>
    %c0_16 = arith.constant 0 : index
    %c0_17 = arith.constant 0 : index
    %16 = vector.load %arg10[%c0_16, %c0_17] : memref<1x32xf32, #tpu.memory_space<vmem>>, vector<1x32xf32>
    %17 = vector.broadcast %16 : vector<1x32xf32> to vector<64x32xf32>
    %18 = arith.addf %15, %17 : vector<64x32xf32>
    %c0_18 = arith.constant 0 : index
    %c0_19 = arith.constant 0 : index
    %19 = vector.load %arg17[%c0_18, %c0_19] : memref<64x32xf32, #tpu.memory_space<vmem>>, vector<64x32xf32>
    tpu.vector_store %arg17[%c0_18, %c0_19], %18 {strides = array<i32>} : memref<64x32xf32, #tpu.memory_space<vmem>>, vector<64x32xf32>,
    %c0_20 = arith.constant 0 : index
    %c0_21 = arith.constant 0 : index
    %20 = vector.load %arg5[%c0_20, %c0_21] : memref<32x32xf32, #tpu.memory_space<vmem>>, vector<32x32xf32>
    %cst_22 = arith.constant dense<0.000000e+00> : vector<64x32xf32>
    %21 = tpu.matmul %7, %20, %cst_22 {dimension_numbers = #tpu.dot_dimension_numbers<[1], [0], [0], [1], [0, 0, 1, 1], [], []>} : vector<64x32xf32>, vector<32x32xf32>, vector<64x32xf32> -> vector<64x32xf32>
    %c0_23 = arith.constant 0 : index
    %c0_24 = arith.constant 0 : index
    %22 = vector.load %arg11[%c0_23, %c0_24] : memref<1x32xf32, #tpu.memory_space<vmem>>, vector<1x32xf32>
    %23 = vector.broadcast %22 : vector<1x32xf32> to vector<64x32xf32>
    %24 = arith.addf %21, %23 : vector<64x32xf32>
    %c0_25 = arith.constant 0 : index
    %c0_26 = arith.constant 0 : index
    %25 = vector.load %arg18[%c0_25, %c0_26] : memref<64x32xf32, #tpu.memory_space<vmem>>, vector<64x32xf32>
    tpu.vector_store %arg18[%c0_25, %c0_26], %24 {strides = array<i32>} : memref<64x32xf32, #tpu.memory_space<vmem>>, vector<64x32xf32>,
    %c0_27 = arith.constant 0 : index
    %c0_28 = arith.constant 0 : index
    %26 = vector.load %arg6[%c0_27, %c0_28] : memref<32x32xf32, #tpu.memory_space<vmem>>, vector<32x32xf32>
    %c0_29 = arith.constant 0 : index
    %c0_30 = arith.constant 0 : index
    %27 = vector.load %arg7[%c0_29, %c0_30] : memref<32x32xf32, #tpu.memory_space<vmem>>, vector<32x32xf32>
    %c0_31 = arith.constant 0 : index
    %c0_32 = arith.constant 0 : index
    %28 = vector.load %arg8[%c0_31, %c0_32] : memref<32x32xf32, #tpu.memory_space<vmem>>, vector<32x32xf32>
    %c0_33 = arith.constant 0 : index
    %c0_34 = arith.constant 0 : index
    %29 = vector.load %arg12[%c0_33, %c0_34] : memref<1x32xf32, #tpu.memory_space<vmem>>, vector<1x32xf32>
    %cst_35 = arith.constant 0.000000e+00 : f32
    %30 = vector.broadcast %cst_35 : f32 to vector<8x32xf32>
    %c0_i32 = arith.constant 0 : i32
    %c8_i32 = arith.constant 8 : i32
    %31 = arith.muli %c0_i32, %c8_i32 : i32
    %32 = tpu.assume_multiple %31, 8 : i32
    %33 = arith.index_cast %32 : i32 to index
    %c0_36 = arith.constant 0 : index
    %34 = vector.load %arg16[%33, %c0_36] : memref<64x32xf32, #tpu.memory_space<vmem>>, vector<8x32xf32>
    %35 = arith.index_cast %32 : i32 to index
    %c0_37 = arith.constant 0 : index
    %36 = vector.load %arg17[%35, %c0_37] : memref<64x32xf32, #tpu.memory_space<vmem>>, vector<8x32xf32>
    %37 = arith.index_cast %32 : i32 to index
    %c0_38 = arith.constant 0 : index
    %38 = vector.load %arg18[%37, %c0_38] : memref<64x32xf32, #tpu.memory_space<vmem>>, vector<8x32xf32>
    %cst_39 = arith.constant dense<0.000000e+00> : vector<8x32xf32>
    %39 = tpu.matmul %30, %26, %cst_39 {dimension_numbers = #tpu.dot_dimension_numbers<[1], [0], [0], [1], [0, 0, 1, 1], [], []>} : vector<8x32xf32>, vector<32x32xf32>, vector<8x32xf32> -> vector<8x32xf32>
    %40 = arith.addf %34, %39 : vector<8x32xf32>
    %41 = arith.negf %40 : vector<8x32xf32>
    %42 = math.exp %41 : vector<8x32xf32>
    %cst_40 = arith.constant 1.000000e+00 : f32
    %43 = vector.broadcast %cst_40 : f32 to vector<8x32xf32>
    %44 = arith.addf %43, %42 : vector<8x32xf32>
    %45 = arith.divf %43, %44 : vector<8x32xf32>
    %cst_41 = arith.constant dense<0.000000e+00> : vector<8x32xf32>
    %46 = tpu.matmul %30, %27, %cst_41 {dimension_numbers = #tpu.dot_dimension_numbers<[1], [0], [0], [1], [0, 0, 1, 1], [], []>} : vector<8x32xf32>, vector<32x32xf32>, vector<8x32xf32> -> vector<8x32xf32>
    %47 = arith.addf %36, %46 : vector<8x32xf32>
    %48 = arith.negf %47 : vector<8x32xf32>
    %49 = math.exp %48 : vector<8x32xf32>
    %cst_42 = arith.constant 1.000000e+00 : f32
    %50 = vector.broadcast %cst_42 : f32 to vector<8x32xf32>
    %51 = arith.addf %50, %49 : vector<8x32xf32>
    %52 = arith.divf %50, %51 : vector<8x32xf32>
    %cst_43 = arith.constant dense<0.000000e+00> : vector<8x32xf32>
    %53 = tpu.matmul %30, %28, %cst_43 {dimension_numbers = #tpu.dot_dimension_numbers<[1], [0], [0], [1], [0, 0, 1, 1], [], []>} : vector<8x32xf32>, vector<32x32xf32>, vector<8x32xf32> -> vector<8x32xf32>
    %54 = vector.broadcast %29 : vector<1x32xf32> to vector<8x32xf32>
    %55 = arith.addf %53, %54 : vector<8x32xf32>
    %56 = arith.mulf %45, %55 : vector<8x32xf32>
    %57 = arith.addf %38, %56 : vector<8x32xf32>
    %58 = math.tanh %57 : vector<8x32xf32>
    %cst_44 = arith.constant 1.000000e+00 : f32
    %59 = vector.broadcast %cst_44 : f32 to vector<8x32xf32>
    %60 = arith.subf %59, %52 : vector<8x32xf32>
    %61 = arith.mulf %60, %58 : vector<8x32xf32>
    %62 = arith.mulf %52, %30 : vector<8x32xf32>
    %63 = arith.addf %61, %62 : vector<8x32xf32>
    %64 = arith.index_cast %32 : i32 to index
    %c0_45 = arith.constant 0 : index
    %65 = vector.load %arg19[%64, %c0_45] : memref<64x32xf32, #tpu.memory_space<vmem>>, vector<8x32xf32>
    tpu.vector_store %arg19[%64, %c0_45], %63 {strides = array<i32>} : memref<64x32xf32, #tpu.memory_space<vmem>>, vector<8x32xf32>,
    %c1_i32 = arith.constant 1 : i32
    %c8_i32_46 = arith.constant 8 : i32
    %66 = arith.muli %c1_i32, %c8_i32_46 : i32
    %67 = tpu.assume_multiple %66, 8 : i32
    %68 = arith.index_cast %67 : i32 to index
    %c0_47 = arith.constant 0 : index
    %69 = vector.load %arg16[%68, %c0_47] : memref<64x32xf32, #tpu.memory_space<vmem>>, vector<8x32xf32>
    %70 = arith.index_cast %67 : i32 to index
    %c0_48 = arith.constant 0 : index
    %71 = vector.load %arg17[%70, %c0_48] : memref<64x32xf32, #tpu.memory_space<vmem>>, vector<8x32xf32>
    %72 = arith.index_cast %67 : i32 to index
    %c0_49 = arith.constant 0 : index
    %73 = vector.load %arg18[%72, %c0_49] : memref<64x32xf32, #tpu.memory_space<vmem>>, vector<8x32xf32>
    %cst_50 = arith.constant dense<0.000000e+00> : vector<8x32xf32>
    %74 = tpu.matmul %63, %26, %cst_50 {dimension_numbers = #tpu.dot_dimension_numbers<[1], [0], [0], [1], [0, 0, 1, 1], [], []>} : vector<8x32xf32>, vector<32x32xf32>, vector<8x32xf32> -> vector<8x32xf32>
    %75 = arith.addf %69, %74 : vector<8x32xf32>
    %76 = arith.negf %75 : vector<8x32xf32>
    %77 = math.exp %76 : vector<8x32xf32>
    %cst_51 = arith.constant 1.000000e+00 : f32
    %78 = vector.broadcast %cst_51 : f32 to vector<8x32xf32>
    %79 = arith.addf %78, %77 : vector<8x32xf32>
    %80 = arith.divf %78, %79 : vector<8x32xf32>
    %cst_52 = arith.constant dense<0.000000e+00> : vector<8x32xf32>
    %81 = tpu.matmul %63, %27, %cst_52 {dimension_numbers = #tpu.dot_dimension_numbers<[1], [0], [0], [1], [0, 0, 1, 1], [], []>} : vector<8x32xf32>, vector<32x32xf32>, vector<8x32xf32> -> vector<8x32xf32>
    %82 = arith.addf %71, %81 : vector<8x32xf32>
    %83 = arith.negf %82 : vector<8x32xf32>
    %84 = math.exp %83 : vector<8x32xf32>
    %cst_53 = arith.constant 1.000000e+00 : f32
    %85 = vector.broadcast %cst_53 : f32 to vector<8x32xf32>
    %86 = arith.addf %85, %84 : vector<8x32xf32>
    %87 = arith.divf %85, %86 : vector<8x32xf32>
    %cst_54 = arith.constant dense<0.000000e+00> : vector<8x32xf32>
    %88 = tpu.matmul %63, %28, %cst_54 {dimension_numbers = #tpu.dot_dimension_numbers<[1], [0], [0], [1], [0, 0, 1, 1], [], []>} : vector<8x32xf32>, vector<32x32xf32>, vector<8x32xf32> -> vector<8x32xf32>
    %89 = vector.broadcast %29 : vector<1x32xf32> to vector<8x32xf32>
    %90 = arith.addf %88, %89 : vector<8x32xf32>
    %91 = arith.mulf %80, %90 : vector<8x32xf32>
    %92 = arith.addf %73, %91 : vector<8x32xf32>
    %93 = math.tanh %92 : vector<8x32xf32>
    %cst_55 = arith.constant 1.000000e+00 : f32
    %94 = vector.broadcast %cst_55 : f32 to vector<8x32xf32>
    %95 = arith.subf %94, %87 : vector<8x32xf32>
    %96 = arith.mulf %95, %93 : vector<8x32xf32>
    %97 = arith.mulf %87, %63 : vector<8x32xf32>
    %98 = arith.addf %96, %97 : vector<8x32xf32>
    %99 = arith.index_cast %67 : i32 to index
    %c0_56 = arith.constant 0 : index
    %100 = vector.load %arg19[%99, %c0_56] : memref<64x32xf32, #tpu.memory_space<vmem>>, vector<8x32xf32>
    tpu.vector_store %arg19[%99, %c0_56], %98 {strides = array<i32>} : memref<64x32xf32, #tpu.memory_space<vmem>>, vector<8x32xf32>,
    %c2_i32 = arith.constant 2 : i32
    %c8_i32_57 = arith.constant 8 : i32
    %101 = arith.muli %c2_i32, %c8_i32_57 : i32
    %102 = tpu.assume_multiple %101, 8 : i32
    %103 = arith.index_cast %102 : i32 to index
    %c0_58 = arith.constant 0 : index
    %104 = vector.load %arg16[%103, %c0_58] : memref<64x32xf32, #tpu.memory_space<vmem>>, vector<8x32xf32>
    %105 = arith.index_cast %102 : i32 to index
    %c0_59 = arith.constant 0 : index
    %106 = vector.load %arg17[%105, %c0_59] : memref<64x32xf32, #tpu.memory_space<vmem>>, vector<8x32xf32>
    %107 = arith.index_cast %102 : i32 to index
    %c0_60 = arith.constant 0 : index
    %108 = vector.load %arg18[%107, %c0_60] : memref<64x32xf32, #tpu.memory_space<vmem>>, vector<8x32xf32>
    %cst_61 = arith.constant dense<0.000000e+00> : vector<8x32xf32>
    %109 = tpu.matmul %98, %26, %cst_61 {dimension_numbers = #tpu.dot_dimension_numbers<[1], [0], [0], [1], [0, 0, 1, 1], [], []>} : vector<8x32xf32>, vector<32x32xf32>, vector<8x32xf32> -> vector<8x32xf32>
    %110 = arith.addf %104, %109 : vector<8x32xf32>
    %111 = arith.negf %110 : vector<8x32xf32>
    %112 = math.exp %111 : vector<8x32xf32>
    %cst_62 = arith.constant 1.000000e+00 : f32
    %113 = vector.broadcast %cst_62 : f32 to vector<8x32xf32>
    %114 = arith.addf %113, %112 : vector<8x32xf32>
    %115 = arith.divf %113, %114 : vector<8x32xf32>
    %cst_63 = arith.constant dense<0.000000e+00> : vector<8x32xf32>
    %116 = tpu.matmul %98, %27, %cst_63 {dimension_numbers = #tpu.dot_dimension_numbers<[1], [0], [0], [1], [0, 0, 1, 1], [], []>} : vector<8x32xf32>, vector<32x32xf32>, vector<8x32xf32> -> vector<8x32xf32>
    %117 = arith.addf %106, %116 : vector<8x32xf32>
    %118 = arith.negf %117 : vector<8x32xf32>
    %119 = math.exp %118 : vector<8x32xf32>
    %cst_64 = arith.constant 1.000000e+00 : f32
    %120 = vector.broadcast %cst_64 : f32 to vector<8x32xf32>
    %121 = arith.addf %120, %119 : vector<8x32xf32>
    %122 = arith.divf %120, %121 : vector<8x32xf32>
    %cst_65 = arith.constant dense<0.000000e+00> : vector<8x32xf32>
    %123 = tpu.matmul %98, %28, %cst_65 {dimension_numbers = #tpu.dot_dimension_numbers<[1], [0], [0], [1], [0, 0, 1, 1], [], []>} : vector<8x32xf32>, vector<32x32xf32>, vector<8x32xf32> -> vector<8x32xf32>
    %124 = vector.broadcast %29 : vector<1x32xf32> to vector<8x32xf32>
    %125 = arith.addf %123, %124 : vector<8x32xf32>
    %126 = arith.mulf %115, %125 : vector<8x32xf32>
    %127 = arith.addf %108, %126 : vector<8x32xf32>
    %128 = math.tanh %127 : vector<8x32xf32>
    %cst_66 = arith.constant 1.000000e+00 : f32
    %129 = vector.broadcast %cst_66 : f32 to vector<8x32xf32>
    %130 = arith.subf %129, %122 : vector<8x32xf32>
    %131 = arith.mulf %130, %128 : vector<8x32xf32>
    %132 = arith.mulf %122, %98 : vector<8x32xf32>
    %133 = arith.addf %131, %132 : vector<8x32xf32>
    %134 = arith.index_cast %102 : i32 to index
    %c0_67 = arith.constant 0 : index
    %135 = vector.load %arg19[%134, %c0_67] : memref<64x32xf32, #tpu.memory_space<vmem>>, vector<8x32xf32>
    tpu.vector_store %arg19[%134, %c0_67], %133 {strides = array<i32>} : memref<64x32xf32, #tpu.memory_space<vmem>>, vector<8x32xf32>,
    %c3_i32 = arith.constant 3 : i32
    %c8_i32_68 = arith.constant 8 : i32
    %136 = arith.muli %c3_i32, %c8_i32_68 : i32
    %137 = tpu.assume_multiple %136, 8 : i32
    %138 = arith.index_cast %137 : i32 to index
    %c0_69 = arith.constant 0 : index
    %139 = vector.load %arg16[%138, %c0_69] : memref<64x32xf32, #tpu.memory_space<vmem>>, vector<8x32xf32>
    %140 = arith.index_cast %137 : i32 to index
    %c0_70 = arith.constant 0 : index
    %141 = vector.load %arg17[%140, %c0_70] : memref<64x32xf32, #tpu.memory_space<vmem>>, vector<8x32xf32>
    %142 = arith.index_cast %137 : i32 to index
    %c0_71 = arith.constant 0 : index
    %143 = vector.load %arg18[%142, %c0_71] : memref<64x32xf32, #tpu.memory_space<vmem>>, vector<8x32xf32>
    %cst_72 = arith.constant dense<0.000000e+00> : vector<8x32xf32>
    %144 = tpu.matmul %133, %26, %cst_72 {dimension_numbers = #tpu.dot_dimension_numbers<[1], [0], [0], [1], [0, 0, 1, 1], [], []>} : vector<8x32xf32>, vector<32x32xf32>, vector<8x32xf32> -> vector<8x32xf32>
    %145 = arith.addf %139, %144 : vector<8x32xf32>
    %146 = arith.negf %145 : vector<8x32xf32>
    %147 = math.exp %146 : vector<8x32xf32>
    %cst_73 = arith.constant 1.000000e+00 : f32
    %148 = vector.broadcast %cst_73 : f32 to vector<8x32xf32>
    %149 = arith.addf %148, %147 : vector<8x32xf32>
    %150 = arith.divf %148, %149 : vector<8x32xf32>
    %cst_74 = arith.constant dense<0.000000e+00> : vector<8x32xf32>
    %151 = tpu.matmul %133, %27, %cst_74 {dimension_numbers = #tpu.dot_dimension_numbers<[1], [0], [0], [1], [0, 0, 1, 1], [], []>} : vector<8x32xf32>, vector<32x32xf32>, vector<8x32xf32> -> vector<8x32xf32>
    %152 = arith.addf %141, %151 : vector<8x32xf32>
    %153 = arith.negf %152 : vector<8x32xf32>
    %154 = math.exp %153 : vector<8x32xf32>
    %cst_75 = arith.constant 1.000000e+00 : f32
    %155 = vector.broadcast %cst_75 : f32 to vector<8x32xf32>
    %156 = arith.addf %155, %154 : vector<8x32xf32>
    %157 = arith.divf %155, %156 : vector<8x32xf32>
    %cst_76 = arith.constant dense<0.000000e+00> : vector<8x32xf32>
    %158 = tpu.matmul %133, %28, %cst_76 {dimension_numbers = #tpu.dot_dimension_numbers<[1], [0], [0], [1], [0, 0, 1, 1], [], []>} : vector<8x32xf32>, vector<32x32xf32>, vector<8x32xf32> -> vector<8x32xf32>
    %159 = vector.broadcast %29 : vector<1x32xf32> to vector<8x32xf32>
    %160 = arith.addf %158, %159 : vector<8x32xf32>
    %161 = arith.mulf %150, %160 : vector<8x32xf32>
    %162 = arith.addf %143, %161 : vector<8x32xf32>
    %163 = math.tanh %162 : vector<8x32xf32>
    %cst_77 = arith.constant 1.000000e+00 : f32
    %164 = vector.broadcast %cst_77 : f32 to vector<8x32xf32>
    %165 = arith.subf %164, %157 : vector<8x32xf32>
    %166 = arith.mulf %165, %163 : vector<8x32xf32>
    %167 = arith.mulf %157, %133 : vector<8x32xf32>
    %168 = arith.addf %166, %167 : vector<8x32xf32>
    %169 = arith.index_cast %137 : i32 to index
    %c0_78 = arith.constant 0 : index
    %170 = vector.load %arg19[%169, %c0_78] : memref<64x32xf32, #tpu.memory_space<vmem>>, vector<8x32xf32>
    tpu.vector_store %arg19[%169, %c0_78], %168 {strides = array<i32>} : memref<64x32xf32, #tpu.memory_space<vmem>>, vector<8x32xf32>,
    %c4_i32 = arith.constant 4 : i32
    %c8_i32_79 = arith.constant 8 : i32
    %171 = arith.muli %c4_i32, %c8_i32_79 : i32
    %172 = tpu.assume_multiple %171, 8 : i32
    %173 = arith.index_cast %172 : i32 to index
    %c0_80 = arith.constant 0 : index
    %174 = vector.load %arg16[%173, %c0_80] : memref<64x32xf32, #tpu.memory_space<vmem>>, vector<8x32xf32>
    %175 = arith.index_cast %172 : i32 to index
    %c0_81 = arith.constant 0 : index
    %176 = vector.load %arg17[%175, %c0_81] : memref<64x32xf32, #tpu.memory_space<vmem>>, vector<8x32xf32>
    %177 = arith.index_cast %172 : i32 to index
    %c0_82 = arith.constant 0 : index
    %178 = vector.load %arg18[%177, %c0_82] : memref<64x32xf32, #tpu.memory_space<vmem>>, vector<8x32xf32>
    %cst_83 = arith.constant dense<0.000000e+00> : vector<8x32xf32>
    %179 = tpu.matmul %168, %26, %cst_83 {dimension_numbers = #tpu.dot_dimension_numbers<[1], [0], [0], [1], [0, 0, 1, 1], [], []>} : vector<8x32xf32>, vector<32x32xf32>, vector<8x32xf32> -> vector<8x32xf32>
    %180 = arith.addf %174, %179 : vector<8x32xf32>
    %181 = arith.negf %180 : vector<8x32xf32>
    %182 = math.exp %181 : vector<8x32xf32>
    %cst_84 = arith.constant 1.000000e+00 : f32
    %183 = vector.broadcast %cst_84 : f32 to vector<8x32xf32>
    %184 = arith.addf %183, %182 : vector<8x32xf32>
    %185 = arith.divf %183, %184 : vector<8x32xf32>
    %cst_85 = arith.constant dense<0.000000e+00> : vector<8x32xf32>
    %186 = tpu.matmul %168, %27, %cst_85 {dimension_numbers = #tpu.dot_dimension_numbers<[1], [0], [0], [1], [0, 0, 1, 1], [], []>} : vector<8x32xf32>, vector<32x32xf32>, vector<8x32xf32> -> vector<8x32xf32>
    %187 = arith.addf %176, %186 : vector<8x32xf32>
    %188 = arith.negf %187 : vector<8x32xf32>
    %189 = math.exp %188 : vector<8x32xf32>
    %cst_86 = arith.constant 1.000000e+00 : f32
    %190 = vector.broadcast %cst_86 : f32 to vector<8x32xf32>
    %191 = arith.addf %190, %189 : vector<8x32xf32>
    %192 = arith.divf %190, %191 : vector<8x32xf32>
    %cst_87 = arith.constant dense<0.000000e+00> : vector<8x32xf32>
    %193 = tpu.matmul %168, %28, %cst_87 {dimension_numbers = #tpu.dot_dimension_numbers<[1], [0], [0], [1], [0, 0, 1, 1], [], []>} : vector<8x32xf32>, vector<32x32xf32>, vector<8x32xf32> -> vector<8x32xf32>
    %194 = vector.broadcast %29 : vector<1x32xf32> to vector<8x32xf32>
    %195 = arith.addf %193, %194 : vector<8x32xf32>
    %196 = arith.mulf %185, %195 : vector<8x32xf32>
    %197 = arith.addf %178, %196 : vector<8x32xf32>
    %198 = math.tanh %197 : vector<8x32xf32>
    %cst_88 = arith.constant 1.000000e+00 : f32
    %199 = vector.broadcast %cst_88 : f32 to vector<8x32xf32>
    %200 = arith.subf %199, %192 : vector<8x32xf32>
    %201 = arith.mulf %200, %198 : vector<8x32xf32>
    %202 = arith.mulf %192, %168 : vector<8x32xf32>
    %203 = arith.addf %201, %202 : vector<8x32xf32>
    %204 = arith.index_cast %172 : i32 to index
    %c0_89 = arith.constant 0 : index
    %205 = vector.load %arg19[%204, %c0_89] : memref<64x32xf32, #tpu.memory_space<vmem>>, vector<8x32xf32>
    tpu.vector_store %arg19[%204, %c0_89], %203 {strides = array<i32>} : memref<64x32xf32, #tpu.memory_space<vmem>>, vector<8x32xf32>,
    %c5_i32 = arith.constant 5 : i32
    %c8_i32_90 = arith.constant 8 : i32
    %206 = arith.muli %c5_i32, %c8_i32_90 : i32
    %207 = tpu.assume_multiple %206, 8 : i32
    %208 = arith.index_cast %207 : i32 to index
    %c0_91 = arith.constant 0 : index
    %209 = vector.load %arg16[%208, %c0_91] : memref<64x32xf32, #tpu.memory_space<vmem>>, vector<8x32xf32>
    %210 = arith.index_cast %207 : i32 to index
    %c0_92 = arith.constant 0 : index
    %211 = vector.load %arg17[%210, %c0_92] : memref<64x32xf32, #tpu.memory_space<vmem>>, vector<8x32xf32>
    %212 = arith.index_cast %207 : i32 to index
    %c0_93 = arith.constant 0 : index
    %213 = vector.load %arg18[%212, %c0_93] : memref<64x32xf32, #tpu.memory_space<vmem>>, vector<8x32xf32>
    %cst_94 = arith.constant dense<0.000000e+00> : vector<8x32xf32>
    %214 = tpu.matmul %203, %26, %cst_94 {dimension_numbers = #tpu.dot_dimension_numbers<[1], [0], [0], [1], [0, 0, 1, 1], [], []>} : vector<8x32xf32>, vector<32x32xf32>, vector<8x32xf32> -> vector<8x32xf32>
    %215 = arith.addf %209, %214 : vector<8x32xf32>
    %216 = arith.negf %215 : vector<8x32xf32>
    %217 = math.exp %216 : vector<8x32xf32>
    %cst_95 = arith.constant 1.000000e+00 : f32
    %218 = vector.broadcast %cst_95 : f32 to vector<8x32xf32>
    %219 = arith.addf %218, %217 : vector<8x32xf32>
    %220 = arith.divf %218, %219 : vector<8x32xf32>
    %cst_96 = arith.constant dense<0.000000e+00> : vector<8x32xf32>
    %221 = tpu.matmul %203, %27, %cst_96 {dimension_numbers = #tpu.dot_dimension_numbers<[1], [0], [0], [1], [0, 0, 1, 1], [], []>} : vector<8x32xf32>, vector<32x32xf32>, vector<8x32xf32> -> vector<8x32xf32>
    %222 = arith.addf %211, %221 : vector<8x32xf32>
    %223 = arith.negf %222 : vector<8x32xf32>
    %224 = math.exp %223 : vector<8x32xf32>
    %cst_97 = arith.constant 1.000000e+00 : f32
    %225 = vector.broadcast %cst_97 : f32 to vector<8x32xf32>
    %226 = arith.addf %225, %224 : vector<8x32xf32>
    %227 = arith.divf %225, %226 : vector<8x32xf32>
    %cst_98 = arith.constant dense<0.000000e+00> : vector<8x32xf32>
    %228 = tpu.matmul %203, %28, %cst_98 {dimension_numbers = #tpu.dot_dimension_numbers<[1], [0], [0], [1], [0, 0, 1, 1], [], []>} : vector<8x32xf32>, vector<32x32xf32>, vector<8x32xf32> -> vector<8x32xf32>
    %229 = vector.broadcast %29 : vector<1x32xf32> to vector<8x32xf32>
    %230 = arith.addf %228, %229 : vector<8x32xf32>
    %231 = arith.mulf %220, %230 : vector<8x32xf32>
    %232 = arith.addf %213, %231 : vector<8x32xf32>
    %233 = math.tanh %232 : vector<8x32xf32>
    %cst_99 = arith.constant 1.000000e+00 : f32
    %234 = vector.broadcast %cst_99 : f32 to vector<8x32xf32>
    %235 = arith.subf %234, %227 : vector<8x32xf32>
    %236 = arith.mulf %235, %233 : vector<8x32xf32>
    %237 = arith.mulf %227, %203 : vector<8x32xf32>
    %238 = arith.addf %236, %237 : vector<8x32xf32>
    %239 = arith.index_cast %207 : i32 to index
    %c0_100 = arith.constant 0 : index
    %240 = vector.load %arg19[%239, %c0_100] : memref<64x32xf32, #tpu.memory_space<vmem>>, vector<8x32xf32>
    tpu.vector_store %arg19[%239, %c0_100], %238 {strides = array<i32>} : memref<64x32xf32, #tpu.memory_space<vmem>>, vector<8x32xf32>,
    %c6_i32 = arith.constant 6 : i32
    %c8_i32_101 = arith.constant 8 : i32
    %241 = arith.muli %c6_i32, %c8_i32_101 : i32
    %242 = tpu.assume_multiple %241, 8 : i32
    %243 = arith.index_cast %242 : i32 to index
    %c0_102 = arith.constant 0 : index
    %244 = vector.load %arg16[%243, %c0_102] : memref<64x32xf32, #tpu.memory_space<vmem>>, vector<8x32xf32>
    %245 = arith.index_cast %242 : i32 to index
    %c0_103 = arith.constant 0 : index
    %246 = vector.load %arg17[%245, %c0_103] : memref<64x32xf32, #tpu.memory_space<vmem>>, vector<8x32xf32>
    %247 = arith.index_cast %242 : i32 to index
    %c0_104 = arith.constant 0 : index
    %248 = vector.load %arg18[%247, %c0_104] : memref<64x32xf32, #tpu.memory_space<vmem>>, vector<8x32xf32>
    %cst_105 = arith.constant dense<0.000000e+00> : vector<8x32xf32>
    %249 = tpu.matmul %238, %26, %cst_105 {dimension_numbers = #tpu.dot_dimension_numbers<[1], [0], [0], [1], [0, 0, 1, 1], [], []>} : vector<8x32xf32>, vector<32x32xf32>, vector<8x32xf32> -> vector<8x32xf32>
    %250 = arith.addf %244, %249 : vector<8x32xf32>
    %251 = arith.negf %250 : vector<8x32xf32>
    %252 = math.exp %251 : vector<8x32xf32>
    %cst_106 = arith.constant 1.000000e+00 : f32
    %253 = vector.broadcast %cst_106 : f32 to vector<8x32xf32>
    %254 = arith.addf %253, %252 : vector<8x32xf32>
    %255 = arith.divf %253, %254 : vector<8x32xf32>
    %cst_107 = arith.constant dense<0.000000e+00> : vector<8x32xf32>
    %256 = tpu.matmul %238, %27, %cst_107 {dimension_numbers = #tpu.dot_dimension_numbers<[1], [0], [0], [1], [0, 0, 1, 1], [], []>} : vector<8x32xf32>, vector<32x32xf32>, vector<8x32xf32> -> vector<8x32xf32>
    %257 = arith.addf %246, %256 : vector<8x32xf32>
    %258 = arith.negf %257 : vector<8x32xf32>
    %259 = math.exp %258 : vector<8x32xf32>
    %cst_108 = arith.constant 1.000000e+00 : f32
    %260 = vector.broadcast %cst_108 : f32 to vector<8x32xf32>
    %261 = arith.addf %260, %259 : vector<8x32xf32>
    %262 = arith.divf %260, %261 : vector<8x32xf32>
    %cst_109 = arith.constant dense<0.000000e+00> : vector<8x32xf32>
    %263 = tpu.matmul %238, %28, %cst_109 {dimension_numbers = #tpu.dot_dimension_numbers<[1], [0], [0], [1], [0, 0, 1, 1], [], []>} : vector<8x32xf32>, vector<32x32xf32>, vector<8x32xf32> -> vector<8x32xf32>
    %264 = vector.broadcast %29 : vector<1x32xf32> to vector<8x32xf32>
    %265 = arith.addf %263, %264 : vector<8x32xf32>
    %266 = arith.mulf %255, %265 : vector<8x32xf32>
    %267 = arith.addf %248, %266 : vector<8x32xf32>
    %268 = math.tanh %267 : vector<8x32xf32>
    %cst_110 = arith.constant 1.000000e+00 : f32
    %269 = vector.broadcast %cst_110 : f32 to vector<8x32xf32>
    %270 = arith.subf %269, %262 : vector<8x32xf32>
    %271 = arith.mulf %270, %268 : vector<8x32xf32>
    %272 = arith.mulf %262, %238 : vector<8x32xf32>
    %273 = arith.addf %271, %272 : vector<8x32xf32>
    %274 = arith.index_cast %242 : i32 to index
    %c0_111 = arith.constant 0 : index
    %275 = vector.load %arg19[%274, %c0_111] : memref<64x32xf32, #tpu.memory_space<vmem>>, vector<8x32xf32>
    tpu.vector_store %arg19[%274, %c0_111], %273 {strides = array<i32>} : memref<64x32xf32, #tpu.memory_space<vmem>>, vector<8x32xf32>,
    %c7_i32 = arith.constant 7 : i32
    %c8_i32_112 = arith.constant 8 : i32
    %276 = arith.muli %c7_i32, %c8_i32_112 : i32
    %277 = tpu.assume_multiple %276, 8 : i32
    %278 = arith.index_cast %277 : i32 to index
    %c0_113 = arith.constant 0 : index
    %279 = vector.load %arg16[%278, %c0_113] : memref<64x32xf32, #tpu.memory_space<vmem>>, vector<8x32xf32>
    %280 = arith.index_cast %277 : i32 to index
    %c0_114 = arith.constant 0 : index
    %281 = vector.load %arg17[%280, %c0_114] : memref<64x32xf32, #tpu.memory_space<vmem>>, vector<8x32xf32>
    %282 = arith.index_cast %277 : i32 to index
    %c0_115 = arith.constant 0 : index
    %283 = vector.load %arg18[%282, %c0_115] : memref<64x32xf32, #tpu.memory_space<vmem>>, vector<8x32xf32>
    %cst_116 = arith.constant dense<0.000000e+00> : vector<8x32xf32>
    %284 = tpu.matmul %273, %26, %cst_116 {dimension_numbers = #tpu.dot_dimension_numbers<[1], [0], [0], [1], [0, 0, 1, 1], [], []>} : vector<8x32xf32>, vector<32x32xf32>, vector<8x32xf32> -> vector<8x32xf32>
    %285 = arith.addf %279, %284 : vector<8x32xf32>
    %286 = arith.negf %285 : vector<8x32xf32>
    %287 = math.exp %286 : vector<8x32xf32>
    %cst_117 = arith.constant 1.000000e+00 : f32
    %288 = vector.broadcast %cst_117 : f32 to vector<8x32xf32>
    %289 = arith.addf %288, %287 : vector<8x32xf32>
    %290 = arith.divf %288, %289 : vector<8x32xf32>
    %cst_118 = arith.constant dense<0.000000e+00> : vector<8x32xf32>
    %291 = tpu.matmul %273, %27, %cst_118 {dimension_numbers = #tpu.dot_dimension_numbers<[1], [0], [0], [1], [0, 0, 1, 1], [], []>} : vector<8x32xf32>, vector<32x32xf32>, vector<8x32xf32> -> vector<8x32xf32>
    %292 = arith.addf %281, %291 : vector<8x32xf32>
    %293 = arith.negf %292 : vector<8x32xf32>
    %294 = math.exp %293 : vector<8x32xf32>
    %cst_119 = arith.constant 1.000000e+00 : f32
    %295 = vector.broadcast %cst_119 : f32 to vector<8x32xf32>
    %296 = arith.addf %295, %294 : vector<8x32xf32>
    %297 = arith.divf %295, %296 : vector<8x32xf32>
    %cst_120 = arith.constant dense<0.000000e+00> : vector<8x32xf32>
    %298 = tpu.matmul %273, %28, %cst_120 {dimension_numbers = #tpu.dot_dimension_numbers<[1], [0], [0], [1], [0, 0, 1, 1], [], []>} : vector<8x32xf32>, vector<32x32xf32>, vector<8x32xf32> -> vector<8x32xf32>
    %299 = vector.broadcast %29 : vector<1x32xf32> to vector<8x32xf32>
    %300 = arith.addf %298, %299 : vector<8x32xf32>
    %301 = arith.mulf %290, %300 : vector<8x32xf32>
    %302 = arith.addf %283, %301 : vector<8x32xf32>
    %303 = math.tanh %302 : vector<8x32xf32>
    %cst_121 = arith.constant 1.000000e+00 : f32
    %304 = vector.broadcast %cst_121 : f32 to vector<8x32xf32>
    %305 = arith.subf %304, %297 : vector<8x32xf32>
    %306 = arith.mulf %305, %303 : vector<8x32xf32>
    %307 = arith.mulf %297, %273 : vector<8x32xf32>
    %308 = arith.addf %306, %307 : vector<8x32xf32>
    %309 = arith.index_cast %277 : i32 to index
    %c0_122 = arith.constant 0 : index
    %310 = vector.load %arg19[%309, %c0_122] : memref<64x32xf32, #tpu.memory_space<vmem>>, vector<8x32xf32>
    tpu.vector_store %arg19[%309, %c0_122], %308 {strides = array<i32>} : memref<64x32xf32, #tpu.memory_space<vmem>>, vector<8x32xf32>,
    %c8_i32_123 = arith.constant 8 : i32
    %c0_124 = arith.constant 0 : index
    %c0_125 = arith.constant 0 : index
    %311 = vector.load %arg19[%c0_124, %c0_125] : memref<64x32xf32, #tpu.memory_space<vmem>>, vector<64x32xf32>
    %c0_126 = arith.constant 0 : index
    %c0_127 = arith.constant 0 : index
    %312 = vector.load %arg13[%c0_126, %c0_127] : memref<32x1xf32, #tpu.memory_space<vmem>>, vector<32x1xf32>
    %cst_128 = arith.constant dense<0.000000e+00> : vector<64x1xf32>
    %313 = tpu.matmul %311, %312, %cst_128 {dimension_numbers = #tpu.dot_dimension_numbers<[1], [0], [0], [1], [0, 0, 1, 1], [], []>} : vector<64x32xf32>, vector<32x1xf32>, vector<64x1xf32> -> vector<64x1xf32>
    %c0_129 = arith.constant 0 : index
    %c0_130 = arith.constant 0 : index
    %314 = vector.load %arg14[%c0_129, %c0_130] : memref<1x1xf32, #tpu.memory_space<vmem>>, vector<1x1xf32>
    %315 = vector.broadcast %314 : vector<1x1xf32> to vector<64x1xf32>
    %316 = arith.addf %313, %315 : vector<64x1xf32>
    %c0_131 = arith.constant 0 : index
    %c0_132 = arith.constant 0 : index
    %317 = vector.load %arg15[%c0_131, %c0_132] : memref<64x1xf32, #tpu.memory_space<vmem>>, vector<64x1xf32>
    tpu.vector_store %arg15[%c0_131, %c0_132], %316 {strides = array<i32>} : memref<64x1xf32, #tpu.memory_space<vmem>>, vector<64x1xf32>,
    return
  }
}

</mosaic_0001>

<bundles_post_ra>
// kernel: tpu_custom_call.1
= control target key start
LH: loop header
LB: loop body
LE: loop exit
PB: predicated region body
PF: predicated region fallthrough
CT: control target
= control target key end

     0   :  { %s4318_s0 = inlined_call_operand.vmem [shape: f32[64,16], index: 0, kind: input, shape index: {}]   ;;  %s4319_s1 = inlined_call_operand.hbm [shape: f32[16,32], index: 1, kind: input, shape index: {}]   ;;  %s4320_s2 = inlined_call_operand.hbm [shape: f32[1,32], index: 2, kind: input, shape index: {}]   ;;  %s4321_s3 = inlined_call_operand.vmem [shape: f32[32,32], index: 3, kind: input, shape index: {}]   ;;  %s4322_s4 = inlined_call_operand.vmem [shape: f32[32,32], index: 4, kind: input, shape index: {}]   ;;  %s4323_s5 = inlined_call_operand.vmem [shape: f32[32,32], index: 5, kind: input, shape index: {}]   ;;  %s4324_s6 = inlined_call_operand.vmem [shape: f32[32,32], index: 6, kind: input, shape index: {}]   ;;  %s4325_s7 = inlined_call_operand.hbm [shape: f32[32,32], index: 7, kind: input, shape index: {}]   ;;  %s4326_s8 = inlined_call_operand.hbm [shape: f32[32,32], index: 8, kind: input, shape index: {}]   ;;  %s4327_s9 = inlined_call_operand.vmem [shape: f32[1,32], index: 9, kind: input, shape index: {}]   ;;  %s4328_s10 = inlined_call_operand.vmem [shape: f32[1,32], index: 10, kind: input, shape index: {}]   ;;  %s4329_s11 = inlined_call_operand.vmem [shape: f32[1,32], index: 11, kind: input, shape index: {}]   ;;  %s4330_s12 = inlined_call_operand.vmem [shape: f32[1,32], index: 12, kind: input, shape index: {}]   ;;  %s4331_s13 = inlined_call_operand.vmem [shape: f32[32,1], index: 13, kind: input, shape index: {}]   ;;  %s4332_s14 = inlined_call_operand.<no memory space> [shape: f32[1,1], index: 14, kind: input, shape index: {}]   ;;  %s4333_s15 = inlined_call_operand.vmem [shape: f32[64,1], index: 15, kind: output, shape index: {}]  }
   0x1   :  { %v20_v0 = vstv %s4332_s14 }
   0x2   :  { %21 = vst [vmem:[#allocation6] sm:$0x1] %v20_v0 }
   0x3   :  { %22 = vsyncpa [#allocation8], 0 }
   0x4   :  { %23 = vsyncpa [#allocation10], 0 }
   0x5   :  { %24 = vsyncpa [#allocation13], 0  ;;  %s3758_s20 = smov [#allocation9]   ;;  %s3759_s22 = smov [#allocation7]  }
   0x6   :  { %s45_s21 = sshll.u32 %s3758_s20, 4  ;;  %s32_s23 = sshll.u32 %s3759_s22, 4  ;;  %s46_s21 = int_to_ptr.vmem [resolvable:$true] %s45_s21  ;;  %s3850_s23 = int_to_ptr.vmem [resolvable:$true] %s32_s23 }
   0x7   :  { %s3664_s26 = scalar_lea.hbm %s4320_s2, 16 }
   0x8   :  { %p3665_p0 = scmp.ne.s32.totalorder %s4320_s2, %s3664_s26  ;;  %p3668_p1 = scmp.lt.u32.totalorder %s3664_s26, %s4320_s2 }
   0xa   :  { %p3670_p2 = pnand %p3668_p1, %p3665_p0 }
   0xc   :  { %3673 = shalt.err (!%p3670_p2)
}
   0xd   :  { %s3674_s30 = scalar_lea.vmem %s46_s21, 16  ;;  %s3678_s16 = scalar_lea.vmem %s46_s21, 32 }
   0xe   :  { %p3675_p3 = scmp.ne.s32.totalorder %s46_s21, %s3674_s30  ;;  %p3679_p4 = scmp.lt.s32.totalorder %s46_s21, %s46_s21 }
   0xf   :  { %p3680_p5 = scmp.lt.s32.totalorder %s3678_s16, %s3674_s30 }
  0x11   :  { %p3681_p6 = por %p3680_p5, %p3679_p4 }
  0x13   :  { %p3682_p7 = pnand %p3681_p6, %p3675_p3 }
  0x15   :  { %3685 = shalt.err (!%p3682_p7)
}
  0x16   :  { %48 = dma.hbm_to_vmem [thread:$0]  %s4320_s2, 16, %s46_s21, [#allocation10]  }
  0x17   :  { %s3686_s22 = scalar_lea.hbm %s4319_s1, 256 }
  0x18   :  { %p3687_p8 = scmp.ne.s32.totalorder %s4319_s1, %s3686_s22  ;;  %p3690_p9 = scmp.lt.u32.totalorder %s3686_s22, %s4319_s1 }
  0x1a   :  { %p3692_p10 = pnand %p3690_p9, %p3687_p8 }
  0x1c   :  { %3695 = shalt.err (!%p3692_p10)
}
  0x1d   :  { %s3696_s28 = scalar_lea.vmem %s3850_s23, 256  ;;  %p3701_p12 = scmp.lt.s32.totalorder %s3850_s23, %s3850_s23 }
  0x1e   :  { %p3697_p11 = scmp.ne.s32.totalorder %s3850_s23, %s3696_s28  ;;  %p3702_p13 = scmp.lt.s32.totalorder %s3696_s28, %s3696_s28 }
  0x20   :  { %p3703_p0 = por %p3702_p13, %p3701_p12 }
  0x22   :  { %p3704_p1 = pnand %p3703_p0, %p3697_p11 }
  0x24   :  { %3707 = shalt.err (!%p3704_p1)
}
  0x25   :  { %s3760_s2 = smov 128   ;;  %s3761_s21 = smov 8  }
  0x26   :  { %38 = dma.hbm_to_vmem [thread:$0]  %s4319_s1, 256, %s3850_s23, [#allocation8], %s3760_s2, %s3760_s2, %s3761_s21  }
  0x27   :  { %s3762_s30 = smov [#allocation11]   ;;  %s3763_s17 = smov [#allocation12]  }
  0x28   :  { %s62_s16 = sshll.u32 %s3762_s30, 4  ;;  %s74_s18 = sshll.u32 %s3763_s17, 4  ;;  %s63_s16 = int_to_ptr.vmem [resolvable:$true] %s62_s16  ;;  %s3884_s18 = int_to_ptr.vmem [resolvable:$true] %s74_s18 }
  0x29   :  { %s3708_s22 = scalar_lea.hbm %s4325_s7, 512 }
  0x2a   :  { %p3709_p2 = scmp.ne.s32.totalorder %s4325_s7, %s3708_s22  ;;  %p3712_p3 = scmp.lt.u32.totalorder %s3708_s22, %s4325_s7 }
  0x2c   :  { %p3714_p4 = pnand %p3712_p3, %p3709_p2 }
  0x2e   :  { %3717 = shalt.err (!%p3714_p4)
}
  0x2f   :  { %s3718_s1 = scalar_lea.vmem %s63_s16, 512  ;;  %p3723_p6 = scmp.lt.s32.totalorder %s63_s16, %s63_s16 }
  0x30   :  { %p3719_p5 = scmp.ne.s32.totalorder %s63_s16, %s3718_s1  ;;  %p3724_p7 = scmp.lt.s32.totalorder %s3718_s1, %s3718_s1 }
  0x32   :  { %p3725_p8 = por %p3724_p7, %p3723_p6 }
  0x34   :  { %p3726_p9 = pnand %p3725_p8, %p3719_p5 }
  0x36   :  { %3729 = shalt.err (!%p3726_p9)
}
  0x37   :  { %68 = dma.hbm_to_vmem [thread:$0]  %s4325_s7, 512, %s63_s16, [#allocation10], %s3760_s2, %s3760_s2, %s3761_s21  }
  0x38   :  { %s3730_s30 = scalar_lea.hbm %s4326_s8, 512 }
  0x39   :  { %p3731_p10 = scmp.ne.s32.totalorder %s4326_s8, %s3730_s30  ;;  %p3734_p11 = scmp.lt.u32.totalorder %s3730_s30, %s4326_s8 }
  0x3b   :  { %p3736_p12 = pnand %p3734_p11, %p3731_p10 }
  0x3d   :  { %3739 = shalt.err (!%p3736_p12)
}
  0x3e   :  { %s3740_s24 = scalar_lea.vmem %s3884_s18, 512  ;;  %p3745_p0 = scmp.lt.s32.totalorder %s3884_s18, %s3884_s18 }
  0x3f   :  { %p3741_p13 = scmp.ne.s32.totalorder %s3884_s18, %s3740_s24  ;;  %p3746_p1 = scmp.lt.s32.totalorder %s3740_s24, %s3740_s24 }
  0x41   :  { %p3747_p2 = por %p3746_p1, %p3745_p0 }
  0x43   :  { %p3748_p3 = pnand %p3747_p2, %p3741_p13 }
  0x45   :  { %3751 = shalt.err (!%p3748_p3)
}
  0x46   :  { %80 = dma.hbm_to_vmem [thread:$0]  %s4326_s8, 512, %s3884_s18, [#allocation13], %s3760_s2, %s3760_s2, %s3761_s21  }
  0x47   :  { %3752 = dma.done.wait [#allocation8], 256  }
  0x48   :  { %3753 = vsyncadd [#allocation8], 4294967040 }
  0x49   :  { %3754 = dma.done.wait [#allocation10], 528  }
  0x4a   :  { %3755 = vsyncadd [#allocation10], 4294966768 }
  0x4b   :  { %3756 = dma.done.wait [#allocation13], 512  }
  0x4c   :  { %3757 = vsyncadd [#allocation13], 4294966784  ;;  %vm122_vm0 = vcmask 130048   ;;  %v113_v1 = vld [vmem:[#allocation7] sm:$0xff]  ;;  %v114_v2 = vld [vmem:[#allocation7 + $0x8] sm:$0xff]  ;;  %v3764_v27 = vmov 0.0|0.0  }
  0x4d   :  { %v105_v3 = vld [vmem:[%s4318_s0] sm:$0xff]  ;;  %v3393_v4 = vpack.c.bf16 %v114_v2, %v113_v1  ;;  %v106_v6 = vld [vmem:[%s4318_s0 + $0x8] sm:$0xff]  ;;  %v107_v13 = vld [vmem:[%s4318_s0 + $0x10] sm:$0xff]  ;;  %vm271_vm1 = vcmask 261120   ;;  %vm3765_vm2 = vmmov 0   ;;  %v3766_v2 = vmov 0.0  }
  0x4e   :  { %3037 = vmatprep.mubr.msk.f32.mxu0 %vm122_vm0, %v105_v3  ;;  %v109_v5 = vld [vmem:[%s4318_s0 + $0x20] sm:$0xff]  ;;  %v261_v8 = vld [vmem:[%s4321_s3 + $0x8] sm:$0xff]  ;;  %v111_v14 = vld [vmem:[%s4318_s0 + $0x30] sm:$0xff]  ;;  %vm2756_vm3 = vcmask 7168  }
  0x4f   :  { %3394 = vmatprep.subr.bf16.mxu0 %v3393_v4  ;;  %3573 = vmatprep.subr.bf16.mxu1 %v3393_v4  ;;  %v260_v7 = vld [vmem:[%s4321_s3] sm:$0xff]  ;;  %v110_v9 = vld [vmem:[%s4318_s0 + $0x28] sm:$0xff]  ;;  %v108_v16 = vld [vmem:[%s4318_s0 + $0x18] sm:$0xff] }
  0x50   :  { %3396 = vmatpush3.bf16.msra.mxu0 %v3393_v4  ;;  %3574 = vmatpush3.bf16.msra.mxu1 %v3393_v4  ;;  %v3397_v10 = vpack.c.bf16 %v261_v8, %v260_v7  ;;  %v409_v11 = vld [vmem:[%s4322_s4] sm:$0xff]  ;;  %v410_v12 = vld [vmem:[%s4322_s4 + $0x8] sm:$0xff]  ;;  %v112_v17 = vld [vmem:[%s4318_s0 + $0x38] sm:$0xff] }
  0x51   :  { %3043 = vmatprep.mubr.msk.f32.mxu1 %vm122_vm0, %v109_v5  ;;  %v3405_v15 = vpack.c.bf16 %v410_v12, %v409_v11  ;;  %v262_v18 = vld [vmem:[%s4321_s3 + $0x10] sm:$0xff]  ;;  %v263_v19 = vld [vmem:[%s4321_s3 + $0x18] sm:$0xff]  ;;  %v533_v24 = vld [vmem:[%s4323_s5] sm:$0xff] }
  0x52   :  { %3398 = vmatprep.subr.bf16.mxu1 %v3397_v10  ;;  %v3401_v20 = vpack.c.bf16 %v263_v19, %v262_v18  ;;  %v411_v21 = vld [vmem:[%s4322_s4 + $0x10] sm:$0xff]  ;;  %v412_v22 = vld [vmem:[%s4322_s4 + $0x18] sm:$0xff]  ;;  %v534_v25 = vld [vmem:[%s4323_s5 + $0x8] sm:$0xff] }
  0x53   :  { %3038 = vmatmul.mubr.msk.f32.vlgmr.msra.gmra.mrb[0].mxu0 %vm122_vm0, %v106_v6  ;;  %3044 = vmatmul.mubr.msk.f32.vlgmr.msra.gmra.mrb[0].mxu1 %vm122_vm0, %v110_v9  ;;  %v3409_v23 = vpack.c.bf16 %v412_v22, %v411_v21  ;;  %v3413_v26 = vpack.c.bf16 %v534_v25, %v533_v24  ;;  %v2772_v28 = vld [vmem:[#allocation9] ss:$0 sm:$0xff]  ;;  %v657_v34 = vld [vmem:[%s4324_s6] sm:$0xff]  ;;  %v658_v35 = vld [vmem:[%s4324_s6 + $0x8] sm:$0xff] }
  0x54   :  { %3040 = vmatprep.mubr.msk.f32.mxu0 %vm122_vm0, %v107_v13  ;;  %3046 = vmatprep.mubr.msk.f32.mxu1 %vm122_vm0, %v111_v14  ;;  %v535_v37 = vld [vmem:[%s4323_s5 + $0x10] sm:$0xff]  ;;  %v536_v38 = vld [vmem:[%s4323_s5 + $0x18] sm:$0xff]  ;;  %v3996_v42 = vpack.c.bf16 %v658_v35, %v657_v34  ;;  %v663_v4 = vld [vmem:[#allocation11 + $0x10] sm:$0xff] }
  0x55   :  { %3400 = vmatpush3.bf16.msra.mxu1 %v3397_v10  ;;  %3406 = vmatprep.subr.bf16.mxu0 %v3405_v15  ;;  %v3417_v48 = vpack.c.bf16 %v536_v38, %v535_v37  ;;  %v659_v50 = vld [vmem:[%s4324_s6 + $0x10] sm:$0xff]  ;;  %v660_v51 = vld [vmem:[%s4324_s6 + $0x18] sm:$0xff]  ;;  %v667_v7 = vld [vmem:[#allocation12 + $0x10] sm:$0xff] }
  0x56   :  { %3408 = vmatpush3.bf16.msra.mxu0 %v3405_v15  ;;  %3402 = vmatprep.subr.bf16.mxu1 %v3401_v20  ;;  %v4010_v57 = vpack.c.bf16 %v660_v51, %v659_v50  ;;  %v661_v62 = vld [vmem:[#allocation11] sm:$0xff]  ;;  %v662_v63 = vld [vmem:[#allocation11 + $0x8] sm:$0xff]  ;;  %v664_v5 = vld [vmem:[#allocation11 + $0x18] sm:$0xff] }
  0x57   :  { %3041 = vmatmul.mubr.msk.f32.gmra.mrb[2].mxu0 %vm122_vm0, %v108_v16  ;;  %3047 = vmatmul.mubr.msk.f32.gmra.mrb[2].mxu1 %vm122_vm0, %v112_v17  ;;  %v665_v0 = vld [vmem:[#allocation12] sm:$0xff]  ;;  %v666_v1 = vld [vmem:[#allocation12 + $0x8] sm:$0xff]  ;;  %v4030_v3 = vpack.c.bf16 %v662_v63, %v661_v62  ;;  %v668_v8 = vld [vmem:[#allocation12 + $0x18] sm:$0xff]  ;;  %v4038_v9 = vpack.c.bf16 %v664_v5, %v663_v4 }
  0x58   :  { %3410 = vmatprep.subr.bf16.mxu0 %v3409_v23  ;;  %v4032_v6 = vpack.c.bf16 %v666_v1, %v665_v0  ;;  %v4042_v10 = vpack.c.bf16 %v668_v8, %v667_v7  ;;  %v2781_v11 = vld [vmem:[%s4327_s9] ss:$0 sm:$0xff] }
  0x59   :  { %3404 = vmatpush3.bf16.msra.mxu1 %v3401_v20  ;;  %v2790_v12 = vld [vmem:[%s4328_s10] ss:$0 sm:$0xff] }
  0x5a   :  { %3412 = vmatpush3.bf16.msra.mxu0 %v3409_v23  ;;  %3414 = vmatprep.subr.bf16.mxu1 %v3413_v26 }
  0x5b   :  { %3421 = vmatprep.subr.bf16.mxu0 %v3764_v27 }
 0x126   :  { %v3039_v29 = vpop.f32.mrb[0].mxu0  ;;  %v3045_v30 = vpop.f32.mrb[0].mxu1 }
 0x127   :  { %v219_v31 = vadd.f32 %v3039_v29, %v2772_v28  ;;  %v213_v32 = vpop.f32.mrb[1].mxu0  ;;  %v233_v33 = vpop.f32.mrb[1].mxu1  ;;  %v239_v56 = vadd.f32 %v3045_v30, %v2772_v28 }
 0x128   :  { %v214_v36 = vadd.f32 %v2772_v28, %v213_v32  ;;  %v234_v41 = vadd.f32 %v2772_v28, %v233_v33 }
 0x129   :  { %v253_v44 = vmax.f32 %v219_v31, 0.0  ;;  %v257_v59 = vmax.f32 %v239_v56, 0.0 }
 0x12a   :  { %v252_v39 = vmax.f32 %v214_v36, 0.0  ;;  %v3042_v40 = vpop.f32.mrb[2].mxu0  ;;  %v3048_v43 = vpop.f32.mrb[2].mxu1  ;;  %v256_v53 = vmax.f32 %v234_v41, 0.0 }
 0x12b   :  { %v229_v45 = vadd.f32 %v3042_v40, %v2772_v28  ;;  %v223_v46 = vpop.f32.mrb[3].mxu0  ;;  %v243_v47 = vpop.f32.mrb[3].mxu1  ;;  %v249_v60 = vadd.f32 %v3048_v43, %v2772_v28 }
 0x12c   :  { %v224_v49 = vadd.f32 %v2772_v28, %v223_v46  ;;  %3057 = vmatprep.mubr.msk.f32.mxu1 %vm271_vm1, %v252_v39  ;;  %3077 = vmatprep.mubr.msk.f32.mxu0 %vm271_vm1, %v252_v39  ;;  %v244_v54 = vadd.f32 %v2772_v28, %v243_v47  ;;  %v2799_v47 = vld [vmem:[%s4329_s11] ss:$0 sm:$0xff] }
 0x12d   :  { %3058 = vmatmul.mubr.msk.f32.vlgmr.msra.gmra.mrb[4].mxu1 %vm271_vm1, %v253_v44  ;;  %3078 = vmatmul.mubr.msk.f32.vlgmr.msra.gmra.mrb[4].mxu0 %vm271_vm1, %v253_v44  ;;  %v255_v55 = vmax.f32 %v229_v45, 0.0  ;;  %v259_v61 = vmax.f32 %v249_v60, 0.0 }
 0x12e   :  { %v254_v52 = vmax.f32 %v224_v49, 0.0  ;;  %3416 = vmatpush3.bf16.msra.mxu1 %v3413_v26  ;;  %3423 = vmatpush3.bf16.msra.mxu0 %v3996_v42  ;;  %v258_v58 = vmax.f32 %v244_v54, 0.0 }
 0x12f   :  { %3418 = vmatprep.subr.bf16.mxu1 %v3417_v48  ;;  %3424 = vmatprep.subr.bf16.mxu0 %v3764_v27 }
 0x130   :  { %3060 = vmatprep.mubr.msk.f32.mxu1 %vm271_vm1, %v254_v52  ;;  %3080 = vmatprep.mubr.msk.f32.mxu0 %vm271_vm1, %v254_v52 }
 0x131   :  { %3061 = vmatmul.mubr.msk.f32.gmra.mrb[6].mxu1 %vm271_vm1, %v255_v55  ;;  %3081 = vmatmul.mubr.msk.f32.gmra.mrb[6].mxu0 %vm271_vm1, %v255_v55 }
 0x132   :  { %3063 = vmatprep.mubr.msk.f32.mxu1 %vm271_vm1, %v256_v53  ;;  %3083 = vmatprep.mubr.msk.f32.mxu0 %vm271_vm1, %v256_v53 }
 0x133   :  { %3420 = vmatpush3.bf16.msra.mxu1 %v3417_v48  ;;  %3426 = vmatpush3.bf16.msra.mxu0 %v4010_v57 }
 0x134   :  { %3427 = vmatprep.subr.bf16.mxu1 %v3764_v27  ;;  %3433 = vmatprep.subr.bf16.mxu0 %v3764_v27 }
 0x135   :  { %3064 = vmatmul.mubr.msk.f32.gmra.mrb[8].mxu1 %vm271_vm1, %v257_v59  ;;  %3084 = vmatmul.mubr.msk.f32.gmra.mrb[8].mxu0 %vm271_vm1, %v257_v59 }
 0x136   :  { %3066 = vmatprep.mubr.msk.f32.mxu1 %vm271_vm1, %v258_v58  ;;  %3086 = vmatprep.mubr.msk.f32.mxu0 %vm271_vm1, %v258_v58 }
 0x139   :  { %3067 = vmatmul.mubr.msk.f32.gmra.mrb[10].mxu1 %vm271_vm1, %v259_v61  ;;  %3087 = vmatmul.mubr.msk.f32.gmra.mrb[10].mxu0 %vm271_vm1, %v259_v61 }
 0x13a   :  { %3097 = vmatprep.mubr.msk.f32.mxu1 %vm271_vm1, %v252_v39  ;;  %3117 = vmatprep.mubr.msk.f32.mxu0 %vm3765_vm2, %v3766_v2 }
 0x13d   :  { %3098 = vmatmul.mubr.msk.f32.vlgmr.msra.gmra.mrb[12].mxu1 %vm271_vm1, %v253_v44  ;;  %3118 = vmatmul.mubr.f32.vlgmr.msra.gmra.mrb[12].mxu0 %v3766_v2 }
 0x13e   :  { %3429 = vmatpush3.bf16.msra.mxu1 %v4030_v3  ;;  %3100 = vmatprep.mubr.msk.f32.mxu1 %vm271_vm1, %v254_v52 }
 0x13f   :  { %3430 = vmatprep.subr.bf16.mxu1 %v3764_v27  ;;  %3435 = vmatpush3.bf16.msra.mxu0 %v4032_v6 }
 0x140   :  { %3436 = vmatprep.subr.bf16.mxu0 %v3764_v27  ;;  %3139 = vmatprep.mubr.msk.f32.mxu0 %vm3765_vm2, %v3766_v2 }
 0x141   :  { %3101 = vmatmul.mubr.msk.f32.gmra.mrb[14].mxu1 %vm271_vm1, %v255_v55 }
 0x142   :  { %3103 = vmatprep.mubr.msk.f32.mxu1 %vm271_vm1, %v256_v53  ;;  %3432 = vmatpush3.bf16.msra.mxu1 %v4038_v9 }
 0x143   :  { %3438 = vmatpush3.bf16.msra.mxu0 %v4042_v10  ;;  %3439 = vmatprep.subr.bf16.mxu1 %v3764_v27 }
 0x144   :  { %3445 = vmatprep.subr.bf16.mxu0 %v3764_v27 }
 0x145   :  { %3104 = vmatmul.mubr.msk.f32.gmra.mrb[16].mxu1 %vm271_vm1, %v257_v59 }
 0x146   :  { %3106 = vmatprep.mubr.msk.f32.mxu1 %vm271_vm1, %v258_v58  ;;  %3140 = vmatmul.mubr.f32.vlgmr.msra.gmra.mrb[14].mxu0 %v3766_v2 }
 0x147   :  { %3447 = vmatpush3.bf16.msra.mxu0 %v4030_v3  ;;  %3161 = vmatprep.mubr.msk.f32.mxu0 %vm3765_vm2, %v3766_v2 }
 0x148   :  { %3448 = vmatprep.subr.bf16.mxu0 %v3764_v27 }
 0x149   :  { %3107 = vmatmul.mubr.msk.f32.gmra.mrb[18].mxu1 %vm271_vm1, %v259_v61 }
 0x14a   :  { %3128 = vmatprep.mubr.msk.f32.mxu1 %vm3765_vm2, %v3766_v2 }
 0x14b   :  { %3450 = vmatpush3.bf16.msra.mxu0 %v4038_v9 }
 0x14c   :  { %3457 = vmatprep.subr.bf16.mxu0 %v3764_v27 }
 0x14d   :  { %3129 = vmatmul.mubr.f32.vlgmr.msra.gmra.mrb[20].mxu1 %v3766_v2 }
 0x14e   :  { %3441 = vmatpush3.bf16.msra.mxu1 %v3996_v42  ;;  %3150 = vmatprep.mubr.msk.f32.mxu1 %vm3765_vm2, %v3766_v2 }
 0x14f   :  { %3442 = vmatprep.subr.bf16.mxu1 %v3764_v27 }
 0x152   :  { %3444 = vmatpush3.bf16.msra.mxu1 %v4010_v57 }
 0x153   :  { %3451 = vmatprep.subr.bf16.mxu1 %v3764_v27 }
 0x200   :  { %v3059_v13 = vpop.f32.mrb[4].mxu1  ;;  %v3079_v14 = vpop.f32.mrb[4].mxu0 }
 0x201   :  { %v368_v15 = vadd.f32 %v3059_v13, %v2781_v11  ;;  %v492_v16 = vadd.f32 %v3079_v14, %v2790_v12  ;;  %v362_v17 = vpop.f32.mrb[5].mxu1  ;;  %v486_v18 = vpop.f32.mrb[5].mxu0 }
 0x202   :  { %v363_v19 = vadd.f32 %v2781_v11, %v362_v17  ;;  %v487_v20 = vadd.f32 %v2790_v12, %v486_v18 }
 0x203   :  { %402 = vst.msk [vmem:[#allocation2 + $0x8] sm:$0xff] %vm271_vm1, %v368_v15  ;;  %526 = vst.msk [vmem:[#allocation3 + $0x8] sm:$0xff] %vm271_vm1, %v492_v16 }
 0x204   :  { %401 = vst.msk [vmem:[#allocation2] sm:$0xff] %vm271_vm1, %v363_v19  ;;  %525 = vst.msk [vmem:[#allocation3] sm:$0xff] %vm271_vm1, %v487_v20  ;;  %v3062_v21 = vpop.f32.mrb[6].mxu1  ;;  %v3082_v22 = vpop.f32.mrb[6].mxu0  ;;  %v4108_v20 = vld [vmem:[%s4330_s12] ss:$0 sm:$0xff] }
 0x205   :  { %v378_v23 = vadd.f32 %v3062_v21, %v2781_v11  ;;  %v502_v24 = vadd.f32 %v3082_v22, %v2790_v12  ;;  %v372_v25 = vpop.f32.mrb[7].mxu1  ;;  %v496_v26 = vpop.f32.mrb[7].mxu0 }
 0x206   :  { %v373_v28 = vadd.f32 %v2781_v11, %v372_v25  ;;  %v497_v29 = vadd.f32 %v2790_v12, %v496_v26 }
 0x207   :  { %404 = vst.msk [vmem:[#allocation2 + $0x18] sm:$0xff] %vm271_vm1, %v378_v23  ;;  %528 = vst.msk [vmem:[#allocation3 + $0x18] sm:$0xff] %vm271_vm1, %v502_v24 }
 0x208   :  { %403 = vst.msk [vmem:[#allocation2 + $0x10] sm:$0xff] %vm271_vm1, %v373_v28  ;;  %527 = vst.msk [vmem:[#allocation3 + $0x10] sm:$0xff] %vm271_vm1, %v497_v29  ;;  %v3065_v30 = vpop.f32.mrb[8].mxu1  ;;  %v3085_v31 = vpop.f32.mrb[8].mxu0 }
 0x209   :  { %v388_v32 = vadd.f32 %v3065_v30, %v2781_v11  ;;  %v512_v33 = vadd.f32 %v3085_v31, %v2790_v12  ;;  %v382_v34 = vpop.f32.mrb[9].mxu1  ;;  %v506_v35 = vpop.f32.mrb[9].mxu0 }
 0x20a   :  { %v383_v36 = vadd.f32 %v2781_v11, %v382_v34  ;;  %v507_v37 = vadd.f32 %v2790_v12, %v506_v35  ;;  %v915_v35 = vld [vmem:[#allocation2 + $0x8] sm:$0xff] }
 0x20b   :  { %406 = vst.msk [vmem:[#allocation2 + $0x28] sm:$0xff] %vm271_vm1, %v388_v32  ;;  %530 = vst.msk [vmem:[#allocation3 + $0x28] sm:$0xff] %vm271_vm1, %v512_v33  ;;  %v670_v49 = vld [vmem:[#allocation2] sm:$0xff] }
 0x20c   :  { %405 = vst.msk [vmem:[#allocation2 + $0x20] sm:$0xff] %vm271_vm1, %v383_v36  ;;  %529 = vst.msk [vmem:[#allocation3 + $0x20] sm:$0xff] %vm271_vm1, %v507_v37  ;;  %v3068_v38 = vpop.f32.mrb[10].mxu1  ;;  %v3088_v39 = vpop.f32.mrb[10].mxu0  ;;  %v671_v15 = vld [vmem:[#allocation3] sm:$0xff] }
 0x20d   :  { %v398_v40 = vadd.f32 %v3068_v38, %v2781_v11  ;;  %v522_v41 = vadd.f32 %v3088_v39, %v2790_v12  ;;  %v392_v43 = vpop.f32.mrb[11].mxu1  ;;  %v516_v44 = vpop.f32.mrb[11].mxu0 }
 0x20e   :  { %v393_v45 = vadd.f32 %v2781_v11, %v392_v43  ;;  %v517_v46 = vadd.f32 %v2790_v12, %v516_v44  ;;  %v917_v43 = vld [vmem:[#allocation3 + $0x8] sm:$0xff] }
 0x20f   :  { %408 = vst.msk [vmem:[#allocation2 + $0x38] sm:$0xff] %vm271_vm1, %v398_v40  ;;  %532 = vst.msk [vmem:[#allocation3 + $0x38] sm:$0xff] %vm271_vm1, %v522_v41 }
 0x210   :  { %407 = vst.msk [vmem:[#allocation2 + $0x30] sm:$0xff] %vm271_vm1, %v393_v45  ;;  %531 = vst.msk [vmem:[#allocation3 + $0x30] sm:$0xff] %vm271_vm1, %v517_v46  ;;  %v3099_v48 = vpop.f32.mrb[12].mxu1  ;;  %v742_v50 = vpop.f32.mrb[12].mxu0 }
 0x211   :  { %v616_v51 = vadd.f32 %v3099_v48, %v2799_v47  ;;  %v746_v52 = vadd.f32 %v742_v50, %v670_v49  ;;  %v610_v53 = vpop.f32.mrb[13].mxu1  ;;  %v3119_v54 = vpop.f32.mrb[13].mxu0 }
 0x212   :  { %v611_v55 = vadd.f32 %v2799_v47, %v610_v53 }
 0x213   :  { %650 = vst.msk [vmem:[#allocation4 + $0x8] sm:$0xff] %vm271_vm1, %v616_v51  ;;  %v2808_v56 = vmul.f32 -1.442695, %v746_v52 }
 0x214   :  { %649 = vst.msk [vmem:[#allocation4] sm:$0xff] %vm271_vm1, %v611_v55  ;;  %v3102_v58 = vpop.f32.mrb[14].mxu1 }
 0x215   :  { %3584 = vpow2.f32 %v2808_v56  ;;  %v626_v59 = vadd.f32 %v3102_v58, %v2799_v47  ;;  %v620_v60 = vpop.f32.mrb[15].mxu1 }
 0x216   :  { %v621_v61 = vadd.f32 %v2799_v47, %v620_v60 }
 0x217   :  { %652 = vst.msk [vmem:[#allocation4 + $0x18] sm:$0xff] %vm271_vm1, %v626_v59 }
 0x218   :  { %651 = vst.msk [vmem:[#allocation4 + $0x10] sm:$0xff] %vm271_vm1, %v621_v61  ;;  %v3105_v62 = vpop.f32.mrb[16].mxu1 }
 0x219   :  { %v636_v63 = vadd.f32 %v3105_v62, %v2799_v47  ;;  %v630_v0 = vpop.f32.mrb[17].mxu1  ;;  %v902_v1 = vpop.f32.mrb[14].mxu0 }
 0x21a   :  { %v631_v4 = vadd.f32 %v2799_v47, %v630_v0  ;;  %v3141_v5 = vpop.f32.mrb[15].mxu0  ;;  %v903_v21 = vadd.f32 %v4108_v20, %v902_v1  ;;  %v919_v55 = vld [vmem:[#allocation4 + $0x8] sm:$0xff]  ;;  %v1157_v0 = vld [vmem:[#allocation2 + $0x10] sm:$0xff] }
 0x21b   :  { %654 = vst.msk [vmem:[#allocation4 + $0x28] sm:$0xff] %vm271_vm1, %v636_v63  ;;  %v672_v25 = vld [vmem:[#allocation4] sm:$0xff] }
 0x21c   :  { %653 = vst.msk [vmem:[#allocation4 + $0x20] sm:$0xff] %vm271_vm1, %v631_v4  ;;  %v3108_v7 = vpop.f32.mrb[18].mxu1 }
 0x21d   :  { %v646_v8 = vadd.f32 %v3108_v7, %v2799_v47  ;;  %v640_v11 = vpop.f32.mrb[19].mxu1 }
 0x21e   :  { %v641_v12 = vadd.f32 %v2799_v47, %v640_v11 }
 0x21f   :  { %v3585_v13 = vpop.eup %3584  ;;  %656 = vst.msk [vmem:[#allocation4 + $0x38] sm:$0xff] %vm271_vm1, %v646_v8 }
 0x220   :  { %v750_v14 = vadd.f32 1.0, %v3585_v13  ;;  %655 = vst.msk [vmem:[#allocation4 + $0x30] sm:$0xff] %vm271_vm1, %v641_v12  ;;  %v819_v16 = vpop.f32.mrb[20].mxu1  ;;  %v1159_v12 = vld [vmem:[#allocation3 + $0x10] sm:$0xff] }
 0x221   :  { %v823_v17 = vadd.f32 %v819_v16, %v671_v15  ;;  %v3130_v18 = vpop.f32.mrb[21].mxu1 }
 0x222   :  { %3586 = vrcp.f32 %v750_v14 }
 0x223   :  { %v2809_v19 = vmul.f32 -1.442695, %v823_v17 }
 0x225   :  { %3588 = vpow2.f32 %v2809_v19 }
 0x22c   :  { %v3587_v22 = vpop.eup %3586 }
 0x22d   :  { %v906_v23 = vmul.f32 %v3587_v22, %v903_v21 }
 0x22f   :  { %v3589_v24 = vpop.eup %3588  ;;  %v907_v28 = vadd.f32 %v906_v23, %v672_v25  ;;  %v1161_v25 = vld [vmem:[#allocation4 + $0x10] sm:$0xff] }
 0x230   :  { %v827_v26 = vadd.f32 1.0, %v3589_v24 }
 0x232   :  { %3590 = vrcp.f32 %v827_v26 }
 0x233   :  { %3592 = vtanh.f32 %v907_v28 }
 0x23c   :  { %v3591_v29 = vpop.eup %3590 }
 0x23d   :  { %v909_v30 = vsub.f32 1.0, %v3591_v29  ;;  %v3593_v31 = vpop.eup %3592  ;;  %v911_v33 = vmul.f32 0.0, %v3591_v29 }
 0x23f   :  { %v910_v32 = vmul.f32 %v3593_v31, %v909_v30 }
 0x241   :  { %v912_v34 = vadd.f32 %v911_v33, %v910_v32 }
 0x243   :  { %913 = vst.msk [vmem:[#allocation5] sm:$0xff] %vm271_vm1, %v912_v34  ;;  %3151 = vmatmul.mubr.msk.f32.vlgmr.msra.gmra.mrb[22].mxu1 %vm271_vm1, %v912_v34  ;;  %3162 = vmatmul.mubr.msk.f32.vlgmr.msra.gmra.mrb[16].mxu0 %vm271_vm1, %v912_v34 }
 0x244   :  { %3453 = vmatpush3.bf16.msra.mxu1 %v4032_v6  ;;  %3172 = vmatprep.mubr.msk.f32.mxu1 %vm3765_vm2, %v3766_v2 }
 0x245   :  { %3454 = vmatprep.subr.bf16.mxu1 %v3764_v27  ;;  %3459 = vmatpush3.bf16.msra.mxu0 %v3996_v42 }
 0x246   :  { %3460 = vmatprep.subr.bf16.mxu0 %v3764_v27  ;;  %3183 = vmatprep.mubr.msk.f32.mxu0 %vm3765_vm2, %v3766_v2 }
 0x248   :  { %3456 = vmatpush3.bf16.msra.mxu1 %v4042_v10 }
 0x249   :  { %3463 = vmatprep.subr.bf16.mxu1 %v3764_v27  ;;  %3462 = vmatpush3.bf16.msra.mxu0 %v4010_v57 }
 0x24a   :  { %3469 = vmatprep.subr.bf16.mxu0 %v3764_v27 }
 0x24b   :  { %3173 = vmatmul.mubr.msk.f32.vlgmr.msra.gmra.mrb[24].mxu1 %vm271_vm1, %v912_v34 }
 0x24c   :  { %3465 = vmatpush3.bf16.msra.mxu1 %v4030_v3  ;;  %3194 = vmatprep.mubr.msk.f32.mxu1 %vm3765_vm2, %v3766_v2 }
 0x24d   :  { %3466 = vmatprep.subr.bf16.mxu1 %v3764_v27 }
 0x250   :  { %3468 = vmatpush3.bf16.msra.mxu1 %v4038_v9 }
 0x251   :  { %3475 = vmatprep.subr.bf16.mxu1 %v3764_v27 }
 0x316   :  { %v989_v36 = vpop.f32.mrb[22].mxu1  ;;  %v1066_v37 = vpop.f32.mrb[16].mxu0 }
 0x317   :  { %v993_v38 = vadd.f32 %v989_v36, %v915_v35  ;;  %v3152_v39 = vpop.f32.mrb[23].mxu1  ;;  %v3163_v40 = vpop.f32.mrb[17].mxu0  ;;  %v1070_v44 = vadd.f32 %v1066_v37, %v917_v43 }
 0x319   :  { %v2812_v41 = vmul.f32 -1.442695, %v993_v38  ;;  %v2814_v45 = vmul.f32 -1.442695, %v1070_v44 }
 0x31b   :  { %3594 = vpow2.f32 %v2812_v41  ;;  %v1401_v41 = vld [vmem:[#allocation3 + $0x18] sm:$0xff] }
 0x31c   :  { %3596 = vpow2.f32 %v2814_v45 }
 0x31e   :  { %v1143_v46 = vpop.f32.mrb[24].mxu1 }
 0x31f   :  { %v3174_v47 = vpop.f32.mrb[25].mxu1  ;;  %v1144_v52 = vadd.f32 %v4108_v20, %v1143_v46 }
 0x325   :  { %v3595_v48 = vpop.eup %3594 }
 0x326   :  { %v997_v49 = vadd.f32 1.0, %v3595_v48  ;;  %v3597_v50 = vpop.eup %3596 }
 0x327   :  { %v1074_v51 = vadd.f32 1.0, %v3597_v50 }
 0x328   :  { %3598 = vrcp.f32 %v997_v49 }
 0x329   :  { %3600 = vrcp.f32 %v1074_v51 }
 0x332   :  { %v3599_v53 = vpop.eup %3598 }
 0x333   :  { %v1147_v54 = vmul.f32 %v3599_v53, %v1144_v52  ;;  %v3601_v58 = vpop.eup %3600 }
 0x334   :  { %v1150_v59 = vsub.f32 1.0, %v3601_v58  ;;  %v1152_v62 = vmul.f32 %v3601_v58, %v912_v34  ;;  %v1399_v34 = vld [vmem:[#allocation2 + $0x18] sm:$0xff] }
 0x335   :  { %v1148_v56 = vadd.f32 %v1147_v54, %v919_v55  ;;  %v1403_v54 = vld [vmem:[#allocation4 + $0x18] sm:$0xff] }
 0x337   :  { %3602 = vtanh.f32 %v1148_v56 }
 0x341   :  { %v3603_v60 = vpop.eup %3602 }
 0x342   :  { %v1151_v61 = vmul.f32 %v3603_v60, %v1150_v59 }
 0x344   :  { %v1153_v63 = vadd.f32 %v1152_v62, %v1151_v61 }
 0x346   :  { %1155 = vst.msk [vmem:[#allocation5 + $0x8] sm:$0xff] %vm271_vm1, %v1153_v63  ;;  %3184 = vmatmul.mubr.msk.f32.vlgmr.msra.gmra.mrb[18].mxu0 %vm271_vm1, %v1153_v63  ;;  %3195 = vmatmul.mubr.msk.f32.vlgmr.msra.gmra.mrb[26].mxu1 %vm271_vm1, %v1153_v63 }
 0x347   :  { %3471 = vmatpush3.bf16.msra.mxu0 %v4032_v6  ;;  %3205 = vmatprep.mubr.msk.f32.mxu0 %vm3765_vm2, %v3766_v2 }
 0x348   :  { %3472 = vmatprep.subr.bf16.mxu0 %v3764_v27  ;;  %3477 = vmatpush3.bf16.msra.mxu1 %v3996_v42 }
 0x349   :  { %3478 = vmatprep.subr.bf16.mxu1 %v3764_v27  ;;  %3216 = vmatprep.mubr.msk.f32.mxu1 %vm3765_vm2, %v3766_v2 }
 0x34b   :  { %3474 = vmatpush3.bf16.msra.mxu0 %v4042_v10 }
 0x34c   :  { %3481 = vmatprep.subr.bf16.mxu0 %v3764_v27  ;;  %3480 = vmatpush3.bf16.msra.mxu1 %v4010_v57 }
 0x34d   :  { %3487 = vmatprep.subr.bf16.mxu1 %v3764_v27 }
 0x34e   :  { %3206 = vmatmul.mubr.msk.f32.vlgmr.msra.gmra.mrb[20].mxu0 %vm271_vm1, %v1153_v63 }
 0x34f   :  { %3483 = vmatpush3.bf16.msra.mxu0 %v4030_v3  ;;  %3227 = vmatprep.mubr.msk.f32.mxu0 %vm3765_vm2, %v3766_v2 }
 0x350   :  { %3484 = vmatprep.subr.bf16.mxu0 %v3764_v27 }
 0x353   :  { %3486 = vmatpush3.bf16.msra.mxu0 %v4038_v9 }
 0x354   :  { %3493 = vmatprep.subr.bf16.mxu0 %v3764_v27 }
 0x419   :  { %v1231_v1 = vpop.f32.mrb[18].mxu0  ;;  %v1308_v4 = vpop.f32.mrb[26].mxu1 }
 0x41a   :  { %v1235_v5 = vadd.f32 %v1231_v1, %v1157_v0  ;;  %v3185_v7 = vpop.f32.mrb[19].mxu0  ;;  %v3196_v8 = vpop.f32.mrb[27].mxu1  ;;  %v1312_v13 = vadd.f32 %v1308_v4, %v1159_v12 }
 0x41c   :  { %v2817_v11 = vmul.f32 -1.442695, %v1235_v5  ;;  %v2819_v14 = vmul.f32 -1.442695, %v1312_v13 }
 0x41e   :  { %3604 = vpow2.f32 %v2817_v11  ;;  %v1643_v11 = vld [vmem:[#allocation3 + $0x20] sm:$0xff] }
 0x41f   :  { %3606 = vpow2.f32 %v2819_v14 }
 0x421   :  { %v1385_v15 = vpop.f32.mrb[20].mxu0 }
 0x422   :  { %v3207_v16 = vpop.f32.mrb[21].mxu0  ;;  %v1386_v22 = vadd.f32 %v4108_v20, %v1385_v15 }
 0x428   :  { %v3605_v17 = vpop.eup %3604 }
 0x429   :  { %v1239_v18 = vadd.f32 1.0, %v3605_v17  ;;  %v3607_v19 = vpop.eup %3606 }
 0x42a   :  { %v1316_v21 = vadd.f32 1.0, %v3607_v19 }
 0x42b   :  { %3608 = vrcp.f32 %v1239_v18 }
 0x42c   :  { %3610 = vrcp.f32 %v1316_v21 }
 0x435   :  { %v3609_v23 = vpop.eup %3608 }
 0x436   :  { %v1389_v24 = vmul.f32 %v3609_v23, %v1386_v22  ;;  %v3611_v28 = vpop.eup %3610 }
 0x437   :  { %v1392_v29 = vsub.f32 1.0, %v3611_v28  ;;  %v1394_v32 = vmul.f32 %v3611_v28, %v1153_v63  ;;  %v1641_v63 = vld [vmem:[#allocation2 + $0x20] sm:$0xff] }
 0x438   :  { %v1390_v26 = vadd.f32 %v1389_v24, %v1161_v25  ;;  %v1645_v24 = vld [vmem:[#allocation4 + $0x20] sm:$0xff] }
 0x43a   :  { %3612 = vtanh.f32 %v1390_v26 }
 0x444   :  { %v3613_v30 = vpop.eup %3612 }
 0x445   :  { %v1393_v31 = vmul.f32 %v3613_v30, %v1392_v29 }
 0x447   :  { %v1395_v33 = vadd.f32 %v1394_v32, %v1393_v31 }
 0x449   :  { %1397 = vst.msk [vmem:[#allocation5 + $0x10] sm:$0xff] %vm271_vm1, %v1395_v33  ;;  %3217 = vmatmul.mubr.msk.f32.vlgmr.msra.gmra.mrb[28].mxu1 %vm271_vm1, %v1395_v33  ;;  %3228 = vmatmul.mubr.msk.f32.vlgmr.msra.gmra.mrb[22].mxu0 %vm271_vm1, %v1395_v33 }
 0x44a   :  { %3489 = vmatpush3.bf16.msra.mxu1 %v4032_v6  ;;  %3238 = vmatprep.mubr.msk.f32.mxu1 %vm3765_vm2, %v3766_v2 }
 0x44b   :  { %3490 = vmatprep.subr.bf16.mxu1 %v3764_v27  ;;  %3495 = vmatpush3.bf16.msra.mxu0 %v3996_v42 }
 0x44c   :  { %3496 = vmatprep.subr.bf16.mxu0 %v3764_v27  ;;  %3249 = vmatprep.mubr.msk.f32.mxu0 %vm3765_vm2, %v3766_v2 }
 0x44e   :  { %3492 = vmatpush3.bf16.msra.mxu1 %v4042_v10 }
 0x44f   :  { %3499 = vmatprep.subr.bf16.mxu1 %v3764_v27  ;;  %3498 = vmatpush3.bf16.msra.mxu0 %v4010_v57 }
 0x450   :  { %3505 = vmatprep.subr.bf16.mxu0 %v3764_v27 }
 0x451   :  { %3239 = vmatmul.mubr.msk.f32.vlgmr.msra.gmra.mrb[30].mxu1 %vm271_vm1, %v1395_v33 }
 0x452   :  { %3501 = vmatpush3.bf16.msra.mxu1 %v4030_v3  ;;  %3260 = vmatprep.mubr.msk.f32.mxu1 %vm3765_vm2, %v3766_v2 }
 0x453   :  { %3502 = vmatprep.subr.bf16.mxu1 %v3764_v27 }
 0x456   :  { %3504 = vmatpush3.bf16.msra.mxu1 %v4038_v9 }
 0x457   :  { %3511 = vmatprep.subr.bf16.mxu1 %v3764_v27 }
 0x51c   :  { %v1473_v35 = vpop.f32.mrb[28].mxu1  ;;  %v1550_v36 = vpop.f32.mrb[22].mxu0 }
 0x51d   :  { %v1477_v37 = vadd.f32 %v1473_v35, %v1399_v34  ;;  %v3218_v38 = vpop.f32.mrb[29].mxu1  ;;  %v3229_v39 = vpop.f32.mrb[23].mxu0  ;;  %v1554_v43 = vadd.f32 %v1550_v36, %v1401_v41 }
 0x51f   :  { %v2822_v40 = vmul.f32 -1.442695, %v1477_v37  ;;  %v2824_v44 = vmul.f32 -1.442695, %v1554_v43 }
 0x521   :  { %3614 = vpow2.f32 %v2822_v40  ;;  %v1885_v40 = vld [vmem:[#allocation3 + $0x28] sm:$0xff] }
 0x522   :  { %3616 = vpow2.f32 %v2824_v44 }
 0x524   :  { %v1627_v45 = vpop.f32.mrb[30].mxu1 }
 0x525   :  { %v3240_v46 = vpop.f32.mrb[31].mxu1  ;;  %v1628_v51 = vadd.f32 %v4108_v20, %v1627_v45 }
 0x52b   :  { %v3615_v47 = vpop.eup %3614 }
 0x52c   :  { %v1481_v48 = vadd.f32 1.0, %v3615_v47  ;;  %v3617_v49 = vpop.eup %3616 }
 0x52d   :  { %v1558_v50 = vadd.f32 1.0, %v3617_v49 }
 0x52e   :  { %3618 = vrcp.f32 %v1481_v48 }
 0x52f   :  { %3620 = vrcp.f32 %v1558_v50 }
 0x538   :  { %v3619_v52 = vpop.eup %3618 }
 0x539   :  { %v1631_v53 = vmul.f32 %v3619_v52, %v1628_v51  ;;  %v3621_v56 = vpop.eup %3620 }
 0x53a   :  { %v1634_v58 = vsub.f32 1.0, %v3621_v56  ;;  %v1636_v61 = vmul.f32 %v3621_v56, %v1395_v33  ;;  %v1883_v33 = vld [vmem:[#allocation2 + $0x28] sm:$0xff] }
 0x53b   :  { %v1632_v55 = vadd.f32 %v1631_v53, %v1403_v54  ;;  %v1887_v53 = vld [vmem:[#allocation4 + $0x28] sm:$0xff] }
 0x53d   :  { %3622 = vtanh.f32 %v1632_v55 }
 0x547   :  { %v3623_v59 = vpop.eup %3622 }
 0x548   :  { %v1635_v60 = vmul.f32 %v3623_v59, %v1634_v58 }
 0x54a   :  { %v1637_v62 = vadd.f32 %v1636_v61, %v1635_v60 }
 0x54c   :  { %1639 = vst.msk [vmem:[#allocation5 + $0x18] sm:$0xff] %vm271_vm1, %v1637_v62  ;;  %3250 = vmatmul.mubr.msk.f32.vlgmr.msra.gmra.mrb[24].mxu0 %vm271_vm1, %v1637_v62  ;;  %3261 = vmatmul.mubr.msk.f32.vlgmr.msra.gmra.mrb[32].mxu1 %vm271_vm1, %v1637_v62 }
 0x54d   :  { %3507 = vmatpush3.bf16.msra.mxu0 %v4032_v6  ;;  %3271 = vmatprep.mubr.msk.f32.mxu0 %vm3765_vm2, %v3766_v2 }
 0x54e   :  { %3508 = vmatprep.subr.bf16.mxu0 %v3764_v27  ;;  %3513 = vmatpush3.bf16.msra.mxu1 %v3996_v42 }
 0x54f   :  { %3514 = vmatprep.subr.bf16.mxu1 %v3764_v27  ;;  %3282 = vmatprep.mubr.msk.f32.mxu1 %vm3765_vm2, %v3766_v2 }
 0x551   :  { %3510 = vmatpush3.bf16.msra.mxu0 %v4042_v10 }
 0x552   :  { %3517 = vmatprep.subr.bf16.mxu0 %v3764_v27  ;;  %3516 = vmatpush3.bf16.msra.mxu1 %v4010_v57 }
 0x553   :  { %3523 = vmatprep.subr.bf16.mxu1 %v3764_v27 }
 0x554   :  { %3272 = vmatmul.mubr.msk.f32.vlgmr.msra.gmra.mrb[26].mxu0 %vm271_vm1, %v1637_v62 }
 0x555   :  { %3519 = vmatpush3.bf16.msra.mxu0 %v4030_v3  ;;  %3293 = vmatprep.mubr.msk.f32.mxu0 %vm3765_vm2, %v3766_v2 }
 0x556   :  { %3520 = vmatprep.subr.bf16.mxu0 %v3764_v27 }
 0x559   :  { %3522 = vmatpush3.bf16.msra.mxu0 %v4038_v9 }
 0x55a   :  { %3529 = vmatprep.subr.bf16.mxu0 %v3764_v27 }
 0x61f   :  { %v1715_v0 = vpop.f32.mrb[24].mxu0  ;;  %v1792_v1 = vpop.f32.mrb[32].mxu1 }
 0x620   :  { %v1719_v4 = vadd.f32 %v1715_v0, %v1641_v63  ;;  %v3251_v5 = vpop.f32.mrb[25].mxu0  ;;  %v3262_v7 = vpop.f32.mrb[33].mxu1  ;;  %v1796_v12 = vadd.f32 %v1792_v1, %v1643_v11  ;;  %v2125_v63 = vld [vmem:[#allocation2 + $0x30] sm:$0xff] }
 0x622   :  { %v2827_v8 = vmul.f32 -1.442695, %v1719_v4  ;;  %v2829_v13 = vmul.f32 -1.442695, %v1796_v12 }
 0x624   :  { %3624 = vpow2.f32 %v2827_v8  ;;  %v2127_v8 = vld [vmem:[#allocation3 + $0x30] sm:$0xff] }
 0x625   :  { %3626 = vpow2.f32 %v2829_v13 }
 0x627   :  { %v1869_v14 = vpop.f32.mrb[26].mxu0 }
 0x628   :  { %v3273_v15 = vpop.f32.mrb[27].mxu0  ;;  %v1870_v21 = vadd.f32 %v4108_v20, %v1869_v14 }
 0x62e   :  { %v3625_v16 = vpop.eup %3624 }
 0x62f   :  { %v1723_v17 = vadd.f32 1.0, %v3625_v16  ;;  %v3627_v18 = vpop.eup %3626 }
 0x630   :  { %v1800_v19 = vadd.f32 1.0, %v3627_v18 }
 0x631   :  { %3628 = vrcp.f32 %v1723_v17 }
 0x632   :  { %3630 = vrcp.f32 %v1800_v19 }
 0x63b   :  { %v3629_v22 = vpop.eup %3628 }
 0x63c   :  { %v1873_v23 = vmul.f32 %v3629_v22, %v1870_v21  ;;  %v3631_v26 = vpop.eup %3630  ;;  %v2129_v22 = vld [vmem:[#allocation4 + $0x30] sm:$0xff] }
 0x63d   :  { %v1876_v28 = vsub.f32 1.0, %v3631_v26  ;;  %v1878_v31 = vmul.f32 %v3631_v26, %v1637_v62 }
 0x63e   :  { %v1874_v25 = vadd.f32 %v1873_v23, %v1645_v24 }
 0x640   :  { %3632 = vtanh.f32 %v1874_v25 }
 0x64a   :  { %v3633_v29 = vpop.eup %3632 }
 0x64b   :  { %v1877_v30 = vmul.f32 %v3633_v29, %v1876_v28 }
 0x64d   :  { %v1879_v32 = vadd.f32 %v1878_v31, %v1877_v30  ;;  %v2618_v30 = vld [vmem:[%s4331_s13 + $0x10] sm:$0xff]  ;;  %v2619_v31 = vld [vmem:[%s4331_s13 + $0x18] sm:$0xff] }
 0x64f   :  { %1881 = vst.msk [vmem:[#allocation5 + $0x20] sm:$0xff] %vm271_vm1, %v1879_v32  ;;  %3283 = vmatmul.mubr.msk.f32.vlgmr.msra.gmra.mrb[34].mxu1 %vm271_vm1, %v1879_v32  ;;  %3294 = vmatmul.mubr.msk.f32.vlgmr.msra.gmra.mrb[28].mxu0 %vm271_vm1, %v1879_v32 }
 0x650   :  { %3525 = vmatpush3.bf16.msra.mxu1 %v4032_v6  ;;  %3304 = vmatprep.mubr.msk.f32.mxu1 %vm3765_vm2, %v3766_v2 }
 0x651   :  { %3526 = vmatprep.subr.bf16.mxu1 %v3764_v27  ;;  %3531 = vmatpush3.bf16.msra.mxu0 %v3996_v42 }
 0x652   :  { %3532 = vmatprep.subr.bf16.mxu0 %v3764_v27  ;;  %3315 = vmatprep.mubr.msk.f32.mxu0 %vm3765_vm2, %v3766_v2 }
 0x654   :  { %3528 = vmatpush3.bf16.msra.mxu1 %v4042_v10 }
 0x655   :  { %3535 = vmatprep.subr.bf16.mxu1 %v3764_v27  ;;  %3534 = vmatpush3.bf16.msra.mxu0 %v4010_v57 }
 0x656   :  { %3541 = vmatprep.subr.bf16.mxu0 %v3764_v27 }
 0x657   :  { %3305 = vmatmul.mubr.msk.f32.vlgmr.msra.gmra.mrb[36].mxu1 %vm271_vm1, %v1879_v32 }
 0x658   :  { %3537 = vmatpush3.bf16.msra.mxu1 %v4030_v3  ;;  %3326 = vmatprep.mubr.msk.f32.mxu1 %vm3765_vm2, %v3766_v2 }
 0x659   :  { %3538 = vmatprep.subr.bf16.mxu1 %v3764_v27 }
 0x65c   :  { %3540 = vmatpush3.bf16.msra.mxu1 %v4038_v9 }
 0x65d   :  { %3547 = vmatprep.subr.bf16.mxu1 %v3764_v27 }
 0x722   :  { %v1957_v34 = vpop.f32.mrb[34].mxu1  ;;  %v2034_v35 = vpop.f32.mrb[28].mxu0 }
 0x723   :  { %v1961_v36 = vadd.f32 %v1957_v34, %v1883_v33  ;;  %v3284_v37 = vpop.f32.mrb[35].mxu1  ;;  %v3295_v38 = vpop.f32.mrb[29].mxu0  ;;  %v2038_v41 = vadd.f32 %v2034_v35, %v1885_v40  ;;  %v3569_v33 = vpack.c.bf16 %v2619_v31, %v2618_v30  ;;  %v2608_v34 = vld [vmem:[#allocation5] sm:$0xff]  ;;  %v2609_v35 = vld [vmem:[#allocation5 + $0x8] sm:$0xff] }
 0x725   :  { %v2832_v39 = vmul.f32 -1.442695, %v1961_v36  ;;  %v2834_v43 = vmul.f32 -1.442695, %v2038_v41  ;;  %v2611_v36 = vld [vmem:[#allocation5 + $0x18] sm:$0xff] }
 0x727   :  { %3634 = vpow2.f32 %v2832_v39 }
 0x728   :  { %3636 = vpow2.f32 %v2834_v43 }
 0x72a   :  { %v2111_v44 = vpop.f32.mrb[36].mxu1 }
 0x72b   :  { %v3306_v45 = vpop.f32.mrb[37].mxu1  ;;  %v2112_v50 = vadd.f32 %v4108_v20, %v2111_v44 }
 0x72c   :  { %v2369_v45 = vld [vmem:[#allocation3 + $0x38] sm:$0xff] }
 0x731   :  { %v3635_v46 = vpop.eup %3634 }
 0x732   :  { %v1965_v47 = vadd.f32 1.0, %v3635_v46  ;;  %v3637_v48 = vpop.eup %3636 }
 0x733   :  { %v2042_v49 = vadd.f32 1.0, %v3637_v48 }
 0x734   :  { %3638 = vrcp.f32 %v1965_v47  ;;  %v2846_v47 = vld [vmem:[#allocation6] ss:$0 sm:$0xff] }
 0x735   :  { %3640 = vrcp.f32 %v2042_v49 }
 0x73e   :  { %v3639_v51 = vpop.eup %3638 }
 0x73f   :  { %v2115_v52 = vmul.f32 %v3639_v51, %v2112_v50  ;;  %v3641_v55 = vpop.eup %3640 }
 0x740   :  { %v2118_v56 = vsub.f32 1.0, %v3641_v55  ;;  %v2120_v60 = vmul.f32 %v3641_v55, %v1879_v32 }
 0x741   :  { %v2116_v54 = vadd.f32 %v2115_v52, %v1887_v53 }
 0x743   :  { %3642 = vtanh.f32 %v2116_v54 }
 0x74d   :  { %v3643_v58 = vpop.eup %3642 }
 0x74e   :  { %v2119_v59 = vmul.f32 %v3643_v58, %v2118_v56 }
 0x750   :  { %v2121_v61 = vadd.f32 %v2120_v60, %v2119_v59 }
 0x752   :  { %2123 = vst.msk [vmem:[#allocation5 + $0x28] sm:$0xff] %vm271_vm1, %v2121_v61  ;;  %3316 = vmatmul.mubr.msk.f32.vlgmr.msra.gmra.mrb[30].mxu0 %vm271_vm1, %v2121_v61  ;;  %3327 = vmatmul.mubr.msk.f32.vlgmr.msra.gmra.mrb[38].mxu1 %vm271_vm1, %v2121_v61 }
 0x753   :  { %3543 = vmatpush3.bf16.msra.mxu0 %v4032_v6  ;;  %3337 = vmatprep.mubr.msk.f32.mxu0 %vm3765_vm2, %v3766_v2 }
 0x754   :  { %3544 = vmatprep.subr.bf16.mxu0 %v3764_v27  ;;  %3549 = vmatpush3.bf16.msra.mxu1 %v3996_v42  ;;  %v2616_v42 = vld [vmem:[%s4331_s13] sm:$0xff] }
 0x755   :  { %3550 = vmatprep.subr.bf16.mxu1 %v3764_v27  ;;  %3348 = vmatprep.mubr.msk.f32.mxu1 %vm3765_vm2, %v3766_v2 }
 0x757   :  { %3546 = vmatpush3.bf16.msra.mxu0 %v4042_v10 }
 0x758   :  { %3553 = vmatprep.subr.bf16.mxu0 %v3764_v27  ;;  %3552 = vmatpush3.bf16.msra.mxu1 %v4010_v57  ;;  %v2617_v57 = vld [vmem:[%s4331_s13 + $0x8] sm:$0xff] }
 0x759   :  { %3559 = vmatprep.subr.bf16.mxu1 %v3764_v27  ;;  %v3565_v62 = vpack.c.bf16 %v2617_v57, %v2616_v42  ;;  %v2613_v37 = vld [vmem:[#allocation5 + $0x28] sm:$0xff] }
 0x75a   :  { %3338 = vmatmul.mubr.msk.f32.vlgmr.msra.gmra.mrb[32].mxu0 %vm271_vm1, %v2121_v61 }
 0x75b   :  { %3555 = vmatpush3.bf16.msra.mxu0 %v4030_v3  ;;  %3359 = vmatprep.mubr.msk.f32.mxu0 %vm3765_vm2, %v3766_v2 }
 0x75c   :  { %3556 = vmatprep.subr.bf16.mxu0 %v3764_v27 }
 0x75f   :  { %3558 = vmatpush3.bf16.msra.mxu0 %v4038_v9 }
 0x760   :  { %3566 = vmatprep.subr.bf16.mxu0 %v3565_v62 }
 0x825   :  { %v2199_v0 = vpop.f32.mrb[30].mxu0  ;;  %v2276_v3 = vpop.f32.mrb[38].mxu1 }
 0x826   :  { %v2203_v1 = vadd.f32 %v2199_v0, %v2125_v63  ;;  %v3317_v4 = vpop.f32.mrb[31].mxu0  ;;  %v3328_v5 = vpop.f32.mrb[39].mxu1  ;;  %v2280_v11 = vadd.f32 %v2276_v3, %v2127_v8 }
 0x828   :  { %v2837_v7 = vmul.f32 -1.442695, %v2203_v1  ;;  %v2839_v9 = vmul.f32 -1.442695, %v2280_v11 }
 0x82a   :  { %3644 = vpow2.f32 %v2837_v7  ;;  %v2371_v7 = vld [vmem:[#allocation4 + $0x38] sm:$0xff] }
 0x82b   :  { %3646 = vpow2.f32 %v2839_v9 }
 0x82d   :  { %v2353_v12 = vpop.f32.mrb[32].mxu0 }
 0x82e   :  { %v3339_v13 = vpop.f32.mrb[33].mxu0  ;;  %v2354_v18 = vadd.f32 %v4108_v20, %v2353_v12 }
 0x834   :  { %v3645_v14 = vpop.eup %3644 }
 0x835   :  { %v2207_v15 = vadd.f32 1.0, %v3645_v14  ;;  %v3647_v16 = vpop.eup %3646 }
 0x836   :  { %v2284_v17 = vadd.f32 1.0, %v3647_v16 }
 0x837   :  { %3648 = vrcp.f32 %v2207_v15 }
 0x838   :  { %3650 = vrcp.f32 %v2284_v17 }
 0x841   :  { %v3649_v19 = vpop.eup %3648 }
 0x842   :  { %v2357_v21 = vmul.f32 %v3649_v19, %v2354_v18  ;;  %v3651_v24 = vpop.eup %3650 }
 0x843   :  { %v2360_v25 = vsub.f32 1.0, %v3651_v24  ;;  %v2362_v29 = vmul.f32 %v3651_v24, %v2121_v61 }
 0x844   :  { %v2358_v23 = vadd.f32 %v2357_v21, %v2129_v22 }
 0x846   :  { %3652 = vtanh.f32 %v2358_v23 }
 0x850   :  { %v3653_v26 = vpop.eup %3652 }
 0x851   :  { %v2361_v28 = vmul.f32 %v3653_v26, %v2360_v25 }
 0x853   :  { %v4260_v32 = vadd.f32 %v2362_v29, %v2361_v28 }
 0x855   :  { %2365 = vst.msk [vmem:[#allocation5 + $0x30] sm:$0xff] %vm271_vm1, %v4260_v32  ;;  %3349 = vmatmul.mubr.msk.f32.vlgmr.msra.gmra.mrb[40].mxu1 %vm271_vm1, %v4260_v32  ;;  %3360 = vmatmul.mubr.msk.f32.vlgmr.msra.gmra.mrb[34].mxu0 %vm271_vm1, %v4260_v32 }
 0x856   :  { %3561 = vmatpush3.bf16.msra.mxu1 %v4032_v6  ;;  %3568 = vmatpush3.bf16.msra.mxu0 %v3565_v62  ;;  %v2610_v6 = vld [vmem:[#allocation5 + $0x10] sm:$0xff] }
 0x857   :  { %3381 = vmatprep.mubr.msk.f32.mxu0 %vm271_vm1, %v2608_v34  ;;  %3562 = vmatprep.subr.bf16.mxu1 %v3764_v27  ;;  %v2612_v27 = vld [vmem:[#allocation5 + $0x20] sm:$0xff] }
 0x858   :  { %3570 = vmatprep.subr.bf16.mxu0 %v3569_v33  ;;  %3370 = vmatprep.mubr.msk.f32.mxu1 %vm3765_vm2, %v3766_v2 }
 0x85a   :  { %3564 = vmatpush3.bf16.msra.mxu1 %v4042_v10  ;;  %3572 = vmatpush3.bf16.msra.mxu0 %v3569_v33  ;;  %v2367_v10 = vld [vmem:[#allocation2 + $0x38] sm:$0xff] }
 0x85c   :  { %v2614_v2 = vld [vmem:[#allocation5 + $0x30] sm:$0xff] }
 0x85d   :  { %3371 = vmatmul.mubr.msk.f32.vlgmr.msra.gmra.mrb[42].mxu1 %vm271_vm1, %v4260_v32  ;;  %3382 = vmatmul.mubr.msk.f32.vlgmr.msra.gmra.mrb[36].mxu0 %vm271_vm1, %v2609_v35 }
 0x85e   :  { %3384 = vmatprep.mubr.msk.f32.mxu0 %vm271_vm1, %v2610_v6 }
 0x861   :  { %3385 = vmatmul.mubr.msk.f32.gmra.mrb[38].mxu0 %vm271_vm1, %v2611_v36 }
 0x862   :  { %3387 = vmatprep.mubr.msk.f32.mxu0 %vm271_vm1, %v2612_v27 }
 0x865   :  { %3388 = vmatmul.mubr.msk.f32.gmra.mrb[40].mxu0 %vm271_vm1, %v2613_v37 }
 0x866   :  { %3390 = vmatprep.mubr.msk.f32.mxu0 %vm271_vm1, %v2614_v2 }
 0x928   :  { %v2441_v38 = vpop.f32.mrb[40].mxu1  ;;  %v2518_v39 = vpop.f32.mrb[34].mxu0 }
 0x929   :  { %v2445_v40 = vadd.f32 %v2441_v38, %v2367_v10  ;;  %v3350_v41 = vpop.f32.mrb[41].mxu1  ;;  %v3361_v43 = vpop.f32.mrb[35].mxu0  ;;  %v2522_v46 = vadd.f32 %v2518_v39, %v2369_v45 }
 0x92b   :  { %v2842_v44 = vmul.f32 -1.442695, %v2445_v40  ;;  %v2844_v48 = vmul.f32 -1.442695, %v2522_v46 }
 0x92d   :  { %3654 = vpow2.f32 %v2842_v44 }
 0x92e   :  { %3656 = vpow2.f32 %v2844_v48 }
 0x930   :  { %v2595_v49 = vpop.f32.mrb[42].mxu1  ;;  %v3383_v50 = vpop.f32.mrb[36].mxu0 }
 0x931   :  { %v2723_v51 = vadd.f32 %v3383_v50, %v2846_v47  ;;  %v3372_v52 = vpop.f32.mrb[43].mxu1  ;;  %v2717_v53 = vpop.f32.mrb[37].mxu0  ;;  %v2596_v1 = vadd.f32 %v4108_v20, %v2595_v49 }
 0x932   :  { %v2718_v54 = vadd.f32 %v2846_v47, %v2717_v53 }
 0x933   :  { %2758 = vst.msk [vmem:[%s4333_s15 + $0x8] sm:$0xff] %vm2756_vm3, %v2723_v51 }
 0x934   :  { %2757 = vst.msk [vmem:[%s4333_s15] sm:$0xff] %vm2756_vm3, %v2718_v54  ;;  %v3386_v55 = vpop.f32.mrb[38].mxu0 }
 0x935   :  { %v2733_v56 = vadd.f32 %v3386_v55, %v2846_v47  ;;  %v2727_v58 = vpop.f32.mrb[39].mxu0 }
 0x936   :  { %v2728_v59 = vadd.f32 %v2846_v47, %v2727_v58 }
 0x937   :  { %v3655_v60 = vpop.eup %3654  ;;  %2760 = vst.msk [vmem:[%s4333_s15 + $0x18] sm:$0xff] %vm2756_vm3, %v2733_v56 }
 0x938   :  { %v2449_v61 = vadd.f32 1.0, %v3655_v60  ;;  %2759 = vst.msk [vmem:[%s4333_s15 + $0x10] sm:$0xff] %vm2756_vm3, %v2728_v59  ;;  %v3389_v42 = vpop.f32.mrb[40].mxu0  ;;  %v3657_v0 = vpop.eup %3656 }
 0x939   :  { %v2743_v57 = vadd.f32 %v3389_v42, %v2846_v47  ;;  %v2737_v62 = vpop.f32.mrb[41].mxu0  ;;  %v2526_v3 = vadd.f32 1.0, %v3657_v0 }
 0x93a   :  { %3658 = vrcp.f32 %v2449_v61  ;;  %v2738_v63 = vadd.f32 %v2846_v47, %v2737_v62 }
 0x93b   :  { %2762 = vst.msk [vmem:[%s4333_s15 + $0x28] sm:$0xff] %vm2756_vm3, %v2743_v57  ;;  %3660 = vrcp.f32 %v2526_v3 }
 0x93c   :  { %2761 = vst.msk [vmem:[%s4333_s15 + $0x20] sm:$0xff] %vm2756_vm3, %v2738_v63 }
 0x944   :  { %v3659_v4 = vpop.eup %3658 }
 0x945   :  { %v2599_v5 = vmul.f32 %v3659_v4, %v2596_v1  ;;  %v3661_v11 = vpop.eup %3660 }
 0x946   :  { %v2602_v9 = vsub.f32 1.0, %v3661_v11  ;;  %v2604_v13 = vmul.f32 %v3661_v11, %v4260_v32 }
 0x947   :  { %v2600_v8 = vadd.f32 %v2599_v5, %v2371_v7 }
 0x949   :  { %3662 = vtanh.f32 %v2600_v8 }
 0x953   :  { %v3663_v12 = vpop.eup %3662 }
 0x954   :  { %v2603_v14 = vmul.f32 %v3663_v12, %v2602_v9 }
 0x956   :  { %v2605_v15 = vadd.f32 %v2604_v13, %v2603_v14 }
 0x958   :  { %2607 = vst.msk [vmem:[#allocation5 + $0x38] sm:$0xff] %vm271_vm1, %v2605_v15 }
 0x95f   :  { %v2615_v16 = vld [vmem:[#allocation5 + $0x38] sm:$0xff] }
 0x960   :  { %3391 = vmatmul.mubr.msk.f32.gmra.mrb[42].mxu0 %vm271_vm1, %v2615_v16 }
 0xa33   :  { %v3392_v17 = vpop.f32.mrb[42].mxu0 }
 0xa34   :  { %v2753_v20 = vadd.f32 %v3392_v17, %v2846_v47  ;;  %v2747_v18 = vpop.f32.mrb[43].mxu0 }
 0xa35   :  { %v2748_v19 = vadd.f32 %v2846_v47, %v2747_v18 }
 0xa36   :  { %2764 = vst.msk [vmem:[%s4333_s15 + $0x38] sm:$0xff] %vm2756_vm3, %v2753_v20 }
 0xa37   :  { %2763 = vst.msk [vmem:[%s4333_s15 + $0x30] sm:$0xff] %vm2756_vm3, %v2748_v19 }
 0xa38   :  { %2769 = vsyncpa [#allocation8], 1 }
 0xa39   :  { %2770 = vsyncpa [#allocation10], 1 }
 0xa3a   :  { %2771 = vsyncpa [#allocation13], 1 }

</bundles_post_ra>
